<compile_context>
chip_gen: v7x
topology: tpu7x:2x2x1
jax: 0.10.0
libtpu: 0.0.40
codegen_flags: <defaults>
</compile_context>

<pallas_src>
import functools

import numpy as np
import jax
import jax.numpy as jnp
from jax.experimental import pallas as pl
from jax.experimental.pallas import tpu as pltpu

_EPS = 1e-5                              # PyTorch BatchNorm2d default eps
_LANE = 128
_VMEM_LIMIT_BYTES = 40 * 1024 * 1024     # scoped VMEM budget for the big calls
_BLOCK_BUDGET_BYTES = 6 * 1024 * 1024    # per (N,C,T) f32 block (pass B holds ~4)
_RESIDENT_MAX_BYTES = 4 * 1024 * 1024    # fully-fused single-call path threshold


def _sigmoid(z):
    return 1.0 / (1.0 + jnp.exp(-z))


# ----------------------------------------------------------------------------
# Shared per-(n,c) coefficient math: SE (CALayer) MLPs for both RCAB branches +
# analytic BN1 batch statistics.  g/q2 are the per-(n,c) mean / mean-square of
# x over HW.  Emits:
#   P             = s  * x
#   relu(BN1(P1)) = relu(a1 + b1 * x)
# ----------------------------------------------------------------------------
def _se_coeffs(g, q2, w1a, b1a, w2a, b2a, w1b, b1b, w2b, b2b,
               gamma1, beta1, alpha, beta, inv_n):
    def se(w1t, b1, w2t, b2):
        # Tiny SE bottleneck (C x C//16); broadcast-multiply-reduce stays on the
        # proven VPU/XLU path.
        # TODO(synk): switch to jnp.dot(..., preferred_element_type=f32) on the
        #             MXU once C >= 256 makes the contraction non-trivial.
        h = jnp.sum(g[:, :, None] * w1t[None, :, :], axis=1) + b1      # (N, Cr)
        h = jnp.maximum(h, 0.0)
        z = jnp.sum(h[:, :, None] * w2t[None, :, :], axis=1) + b2      # (N, C)
        return _sigmoid(z)

    wa = se(w1a, b1a, w2a, b2a)
    wb = se(w1b, b1b, w2b, b2b)

    s = alpha * (1.0 + wa)               # P  = s  * x          (N, C)
    s1 = beta * (1.0 + wb)               # P1 = 1 - s1 * x      (N, C)

    # BN1 batch statistics of P1 = 1 - s1*x over (N, H, W), per channel.
    m1 = 1.0 - jnp.sum(s1 * g, axis=0, keepdims=True) * inv_n                        # (1, C)
    e2 = jnp.sum(1.0 - 2.0 * s1 * g + (s1 * s1) * q2, axis=0, keepdims=True) * inv_n
    var1 = jnp.maximum(e2 - m1 * m1, 0.0)
    k1 = jax.lax.rsqrt(var1 + _EPS) * gamma1                                          # (1, C)

    a1 = (1.0 - m1) * k1 + beta1         # (1, C)
    b1 = -(s1 * k1)                      # (N, C)
    return s, a1, b1


# ----------------------------------------------------------------------------
# Resident path: one fused kernel, x read once, full-array blocks.
# ----------------------------------------------------------------------------
def _fm_fused_kernel(x_ref,
                     w1a_ref, b1a_ref, w2a_ref, b2a_ref,
                     w1b_ref, b1b_ref, w2b_ref, b2b_ref,
                     g1_ref, bt1_ref, g2_ref, bt2_ref, ab_ref,
                     o_ref, *, inv_hw, inv_n, inv_count):
    x = x_ref[...]                                        # (N, C, HW)
    g = jnp.sum(x, axis=2) * inv_hw                       # (N, C)
    q2 = jnp.sum(x * x, axis=2) * inv_hw                  # (N, C)
    s, a1, b1 = _se_coeffs(
        g, q2,
        w1a_ref[...], b1a_ref[...], w2a_ref[...], b2a_ref[...],
        w1b_ref[...], b1b_ref[...], w2b_ref[...], b2b_ref[...],
        g1_ref[...], bt1_ref[...], ab_ref[0, 0], ab_ref[0, 1], inv_n)

    qv = s[:, :, None] * x + jnp.maximum(a1[:, :, None] + b1[:, :, None] * x, 0.0)
    qs = jnp.sum(jnp.sum(qv, axis=2, keepdims=True), axis=0, keepdims=True)     # (1, C, 1)
    qq = jnp.sum(jnp.sum(qv * qv, axis=2, keepdims=True), axis=0, keepdims=True)

    m2 = qs * inv_count
    var2 = jnp.maximum(qq * inv_count - m2 * m2, 0.0)
    scale = jax.lax.rsqrt(var2 + _EPS) * g2_ref[...]      # (1, C, 1)
    shift = bt2_ref[...] - m2 * scale
    o_ref[...] = jnp.maximum(qv * scale + shift, 0.0)


# ----------------------------------------------------------------------------
# Tiled pass A: per-(n,c) x moments over HW tiles + coefficient epilogue.
# ----------------------------------------------------------------------------
def _stats_coeff_kernel(x_ref,
                        w1a_ref, b1a_ref, w2a_ref, b2a_ref,
                        w1b_ref, b1b_ref, w2b_ref, b2b_ref,
                        g1_ref, bt1_ref, ab_ref,
                        s_ref, a1_ref, b1_ref,
                        xsum, xsq,
                        *, hw, tile, inv_hw, inv_n, need_mask):
    i = pl.program_id(0)

    @pl.when(i == 0)
    def _():
        xsum[...] = jnp.zeros_like(xsum)
        xsq[...] = jnp.zeros_like(xsq)

    x = x_ref[...]                                        # (N, C, T)
    if need_mask:
        lane = jax.lax.broadcasted_iota(jnp.int32, x.shape, 2)
        x = jnp.where(i * tile + lane < hw, x, 0.0)       # zero the OOB tail lanes
    xsum[...] += jnp.sum(x, axis=2)                       # (N, C)
    xsq[...] += jnp.sum(x * x, axis=2)

    @pl.when(i == pl.num_programs(0) - 1)
    def _():
        g = xsum[...] * inv_hw
        q2 = xsq[...] * inv_hw
        s, a1, b1 = _se_coeffs(
            g, q2,
            w1a_ref[...], b1a_ref[...], w2a_ref[...], b2a_ref[...],
            w1b_ref[...], b1b_ref[...], w2b_ref[...], b2b_ref[...],
            g1_ref[...], bt1_ref[...], ab_ref[0, 0], ab_ref[0, 1], inv_n)
        s_ref[...] = s
        a1_ref[...] = a1
        b1_ref[...] = b1


# ----------------------------------------------------------------------------
# Tiled pass B: 2-phase grid.  Phase 0: accumulate per-channel stats of
# Q = s*x + relu(a1 + b1*x) into VMEM scratch.  Phase 1: recompute Q, apply
# the final BatchNorm (batch stats) + ReLU and write the lane-dense output.
# ----------------------------------------------------------------------------
def _qstat_finalize_kernel(x_ref, s_ref, a1_ref, b1_ref, g2_ref, bt2_ref,
                           o_ref, qsum, qsq,
                           *, hw, tile, inv_count, need_mask):
    p = pl.program_id(0)      # phase
    i = pl.program_id(1)      # HW tile

    @pl.when(jnp.logical_and(p == 0, i == 0))
    def _():
        qsum[...] = jnp.zeros_like(qsum)
        qsq[...] = jnp.zeros_like(qsq)

    x = x_ref[...]                                                        # (N, C, T)
    q = s_ref[...] * x + jnp.maximum(a1_ref[...] + b1_ref[...] * x, 0.0)  # (N, C, T)

    @pl.when(p == 0)
    def _():
        qm = q
        if need_mask:
            lane = jax.lax.broadcasted_iota(jnp.int32, q.shape, 2)
            qm = jnp.where(i * tile + lane < hw, q, 0.0)
        qsum[...] += jnp.sum(jnp.sum(qm, axis=2, keepdims=True), axis=0, keepdims=True)
        qsq[...] += jnp.sum(jnp.sum(qm * qm, axis=2, keepdims=True), axis=0, keepdims=True)

    @pl.when(p == 1)
    def _():
        m2 = qsum[...] * inv_count                                        # (1, C, 1)
        var2 = jnp.maximum(qsq[...] * inv_count - m2 * m2, 0.0)
        scale = jax.lax.rsqrt(var2 + _EPS) * g2_ref[...]
        shift = bt2_ref[...] - m2 * scale
        o_ref[...] = jnp.maximum(q * scale + shift, 0.0)


# ----------------------------------------------------------------------------
# Wrapper
# ----------------------------------------------------------------------------
def _pick_hw_tile(n, c, hw, max_tile):
    """Largest multiple of 128 lanes that fits the per-block byte budget."""
    hw_pad = ((hw + _LANE - 1) // _LANE) * _LANE
    cap = max(_BLOCK_BUDGET_BYTES // (n * c * 4), _LANE)
    cap = max((cap // _LANE) * _LANE, _LANE)
    mt = max((int(max_tile) // _LANE) * _LANE, _LANE)
    return max(min(mt, hw_pad, cap), _LANE)


def _coeff_operands(params, C, f32):
    ra, rb = params["rcab"], params["rcab1"]
    cr = ra["w1"].shape[0]
    ops = [
        ra["w1"].T.astype(f32), ra["b1"].reshape(1, cr).astype(f32),
        ra["w2"].T.astype(f32), ra["b2"].reshape(1, C).astype(f32),
        rb["w1"].T.astype(f32), rb["b1"].reshape(1, cr).astype(f32),
        rb["w2"].T.astype(f32), rb["b2"].reshape(1, C).astype(f32),
        params["bn1_gamma"].reshape(1, C).astype(f32),
        params["bn1_beta"].reshape(1, C).astype(f32),
    ]
    ab = jnp.concatenate([params["alpha"], params["beta"]]).reshape(1, 2).astype(f32)
    return ops, ab


def _fm_forward_resident(x3, params, N, C, HW):
    f32 = jnp.float32
    ops, ab = _coeff_operands(params, C, f32)
    g23 = params["bn_gamma"].reshape(1, C, 1).astype(f32)
    bt23 = params["bn_beta"].reshape(1, C, 1).astype(f32)

    full = lambda shape: pl.BlockSpec(shape, lambda i: tuple(0 for _ in shape))
    in_specs = ([full((N, C, HW))] + [full(a.shape) for a in ops]
                + [full(g23.shape), full(bt23.shape)]
                + [pl.BlockSpec((1, 2), lambda i: (0, 0),
                                memory_space=pltpu.MemorySpace.SMEM)])

    return pl.pallas_call(
        functools.partial(_fm_fused_kernel, inv_hw=1.0 / HW, inv_n=1.0 / N,
                          inv_count=1.0 / (N * HW)),
        grid=(1,),
        in_specs=in_specs,
        out_specs=full((N, C, HW)),
        out_shape=jax.ShapeDtypeStruct((N, C, HW), f32),
        compiler_params=pltpu.CompilerParams(
            dimension_semantics=("arbitrary",),
            vmem_limit_bytes=_VMEM_LIMIT_BYTES),
    )(x3, *ops, g23, bt23, ab)


def _fm_forward_tiled(x3, params, N, C, HW, max_tile):
    f32 = jnp.float32
    T = _pick_hw_tile(N, C, HW, max_tile)
    nT = pl.cdiv(HW, T)
    need_mask = (HW % T) != 0

    ops, ab = _coeff_operands(params, C, f32)

    # -- pass A: x moments + SE/BN1 coefficient epilogue ----------------------
    full_a = lambda shape: pl.BlockSpec(shape, lambda i: tuple(0 for _ in shape))
    x_spec_a = pl.BlockSpec((N, C, T), lambda i: (0, 0, i))
    in_specs_a = ([x_spec_a] + [full_a(a.shape) for a in ops]
                  + [pl.BlockSpec((1, 2), lambda i: (0, 0),
                                  memory_space=pltpu.MemorySpace.SMEM)])

    s_nc, a1_c, b1_nc = pl.pallas_call(
        functools.partial(_stats_coeff_kernel, hw=HW, tile=T,
                          inv_hw=1.0 / HW, inv_n=1.0 / N, need_mask=need_mask),
        grid=(nT,),
        in_specs=in_specs_a,
        out_specs=(full_a((N, C)), full_a((1, C)), full_a((N, C))),
        out_shape=(jax.ShapeDtypeStruct((N, C), f32),
                   jax.ShapeDtypeStruct((1, C), f32),
                   jax.ShapeDtypeStruct((N, C), f32)),
        scratch_shapes=[pltpu.VMEM((N, C), f32), pltpu.VMEM((N, C), f32)],
        compiler_params=pltpu.CompilerParams(
            dimension_semantics=("arbitrary",),
            vmem_limit_bytes=_VMEM_LIMIT_BYTES),
    )(x3, *ops, ab)

    # -- pass B: Q stats (phase 0) + final BN + ReLU (phase 1) ----------------
    s3 = s_nc.reshape(N, C, 1)
    a13 = a1_c.reshape(1, C, 1)
    b13 = b1_nc.reshape(N, C, 1)
    g23 = params["bn_gamma"].reshape(1, C, 1).astype(f32)
    bt23 = params["bn_beta"].reshape(1, C, 1).astype(f32)

    x_spec_b = pl.BlockSpec((N, C, T), lambda p, i: (0, 0, i))
    nc1_b = pl.BlockSpec((N, C, 1), lambda p, i: (0, 0, 0))
    c1_b = pl.BlockSpec((1, C, 1), lambda p, i: (0, 0, 0))
    # Output stays on block 0 during phase 0 (never written back), then follows
    # the tile index in phase 1 -> each output block is written to HBM once.
    out_spec_b = pl.BlockSpec((N, C, T), lambda p, i: (0, 0, i * p))

    out3 = pl.pallas_call(
        functools.partial(_qstat_finalize_kernel, hw=HW, tile=T,
                          inv_count=1.0 / (N * HW), need_mask=need_mask),
        grid=(2, nT),
        in_specs=[x_spec_b, nc1_b, c1_b, nc1_b, c1_b, c1_b],
        out_specs=out_spec_b,
        out_shape=jax.ShapeDtypeStruct((N, C, HW), f32),
        scratch_shapes=[pltpu.VMEM((1, C, 1), f32), pltpu.VMEM((1, C, 1), f32)],
        compiler_params=pltpu.CompilerParams(
            dimension_semantics=("arbitrary", "arbitrary"),
            vmem_limit_bytes=_VMEM_LIMIT_BYTES),
    )(x3, s3, a13, b13, g23, bt23)
    return out3


def fm_forward(x, params, *, max_tile=2048, resident_max_bytes=_RESIDENT_MAX_BYTES):
    N, C, H, W = x.shape
    HW = H * W
    x3 = x.astype(jnp.float32).reshape(N, C, HW)   # NCHW -> (N, C, HW): HW on the lane axis
    hw_pad = ((HW + _LANE - 1) // _LANE) * _LANE
    if N * C * hw_pad * 4 <= resident_max_bytes:
        out3 = _fm_forward_resident(x3, params, N, C, HW)
    else:
        out3 = _fm_forward_tiled(x3, params, N, C, HW, max_tile)
    return out3.reshape(N, C, H, W)


# ----------------------------------------------------------------------------
# Pure-JAX reference (mirrors the PyTorch FM.forward in training mode)
# ----------------------------------------------------------------------------
def fm_reference(x, p):
    def calayer(w1, b1, w2, b2):
        y = jnp.mean(x, axis=(2, 3))                     # (N, C) global avg pool
        h = jnp.maximum(y @ w1.T + b1, 0.0)              # (N, Cr)
        w = _sigmoid(h @ w2.T + b2)                      # (N, C)
        return x * w[:, :, None, None]

    def bn_train(v, gamma, beta):
        m = jnp.mean(v, axis=(0, 2, 3), keepdims=True)
        var = jnp.mean((v - m) ** 2, axis=(0, 2, 3), keepdims=True)
        return ((v - m) * jax.lax.rsqrt(var + _EPS) * gamma[None, :, None, None]
                + beta[None, :, None, None])

    P = calayer(**p["rcab"]) + x
    P1 = calayer(**p["rcab1"]) + x
    P = P * p["alpha"][0]
    P1 = 1.0 - P1 * p["beta"][0]
    P1 = jnp.maximum(bn_train(P1, p["bn1_gamma"], p["bn1_beta"]), 0.0)
    P = P + P1
    P = jnp.maximum(bn_train(P, p["bn_gamma"], p["bn_beta"]), 0.0)
    return P


# ----------------------------------------------------------------------------
# Deterministic parameter construction (shapes per FM/RCAB/CALayer __init__)
# ----------------------------------------------------------------------------
def init_fm_params(key, channel, reduction=16):
    cr = max(channel // reduction, 1)
    ks = jax.random.split(key, 8)

    def conv1x1(k, cin, cout):
        kw, kb = jax.random.split(k)
        w = jax.random.normal(kw, (cout, cin), jnp.float32) / np.sqrt(cin)
        b = 0.05 * jax.random.normal(kb, (cout,), jnp.float32)
        return w, b

    w1a, b1a = conv1x1(ks[0], channel, cr)
    w2a, b2a = conv1x1(ks[1], cr, channel)
    w1b, b1b = conv1x1(ks[2], channel, cr)
    w2b, b2b = conv1x1(ks[3], cr, channel)
    return dict(
        rcab=dict(w1=w1a, b1=b1a, w2=w2a, b2=b2a),
        rcab1=dict(w1=w1b, b1=b1b, w2=w2b, b2=b2b),
        alpha=jnp.ones((1,), jnp.float32),   # nn.Parameter(torch.ones(1))
        beta=jnp.ones((1,), jnp.float32),    # nn.Parameter(torch.ones(1))
        bn1_gamma=1.0 + 0.1 * jax.random.normal(ks[4], (channel,), jnp.float32),
        bn1_beta=0.1 * jax.random.normal(ks[5], (channel,), jnp.float32),
        bn_gamma=1.0 + 0.1 * jax.random.normal(ks[6], (channel,), jnp.float32),
        bn_beta=0.1 * jax.random.normal(ks[7], (channel,), jnp.float32),
    )


# ----------------------------------------------------------------------------
if __name__ == "__main__":
    key = jax.random.PRNGKey(0)
    kp, kx = jax.random.split(key)
    C = 32  # channel must be >= the CALayer reduction (16)
    params = init_fm_params(kp, C)

    # (shape, max_tile, resident_max_bytes):
    #  1) fused resident path, HW a multiple of 128
    #  2) fused resident path, HW = 121 (realistic non-aligned spatial size)
    #  3) tiled path forced, multi-tile grid (accumulators + 2-phase pass B)
    #  4) tiled path forced, masked tail tile (HW = 169, T = 128)
    cases = [
        ((2, C, 16, 16), 2048, _RESIDENT_MAX_BYTES),
        ((2, C, 11, 11), 2048, _RESIDENT_MAX_BYTES),
        ((2, C, 16, 16), 128, 0),
        ((2, C, 13, 13), 128, 0),
    ]
    for shape, max_tile, res_max in cases:
        kx, sub = jax.random.split(kx)
        x = jax.random.normal(sub, shape, jnp.float32)
        fwd = jax.jit(lambda a, mt=max_tile, rm=res_max:
                      fm_forward(a, params, max_tile=mt, resident_max_bytes=rm))
        out = fwd(x)
        jax.block_until_ready(out)
        assert out.shape == shape
        assert bool(jnp.all(jnp.isfinite(out)))
        ref = fm_reference(x, params)
        err = float(jnp.max(jnp.abs(out - ref)))
        assert err < 3e-3, f"{shape}, max_tile={max_tile}: max abs err = {err}"

    print("KERNEL_OK")
</pallas_src>

<mosaic_0001>
module attributes {stable_mosaic.version = 11 : i64} {
  func.func @_fm_fused_kernel(%arg0: i32, %arg1: memref<2x32x256xf32, #tpu.memory_space<vmem>>, %arg2: memref<32x2xf32, #tpu.memory_space<vmem>>, %arg3: memref<1x2xf32, #tpu.memory_space<vmem>>, %arg4: memref<2x32xf32, #tpu.memory_space<vmem>>, %arg5: memref<1x32xf32, #tpu.memory_space<vmem>>, %arg6: memref<32x2xf32, #tpu.memory_space<vmem>>, %arg7: memref<1x2xf32, #tpu.memory_space<vmem>>, %arg8: memref<2x32xf32, #tpu.memory_space<vmem>>, %arg9: memref<1x32xf32, #tpu.memory_space<vmem>>, %arg10: memref<1x32xf32, #tpu.memory_space<vmem>>, %arg11: memref<1x32xf32, #tpu.memory_space<vmem>>, %arg12: memref<1x32x1xf32, #tpu.memory_space<vmem>>, %arg13: memref<1x32x1xf32, #tpu.memory_space<vmem>>, %arg14: memref<1x2xf32, #tpu.memory_space<smem>>, %arg15: memref<2x32x256xf32, #tpu.memory_space<vmem>>) attributes {dimension_semantics = [#tpu.dimension_semantics<arbitrary>], iteration_bounds = array<i64: 1>, scalar_prefetch = 0 : i64, scratch_operands = 0 : i64, tpu.core_type = #tpu.core_type<tc>, window_params = [{pipeline_mode = #tpu.pipeline_mode<synchronous>, transform_indices = @transform_0, window_bounds = array<i64: 2, 32, 256>}, {pipeline_mode = #tpu.pipeline_mode<synchronous>, transform_indices = @transform_1, window_bounds = array<i64: 32, 2>}, {pipeline_mode = #tpu.pipeline_mode<synchronous>, transform_indices = @transform_2, window_bounds = array<i64: 1, 2>}, {pipeline_mode = #tpu.pipeline_mode<synchronous>, transform_indices = @transform_3, window_bounds = array<i64: 2, 32>}, {pipeline_mode = #tpu.pipeline_mode<synchronous>, transform_indices = @transform_4, window_bounds = array<i64: 1, 32>}, {pipeline_mode = #tpu.pipeline_mode<synchronous>, transform_indices = @transform_5, window_bounds = array<i64: 32, 2>}, {pipeline_mode = #tpu.pipeline_mode<synchronous>, transform_indices = @transform_6, window_bounds = array<i64: 1, 2>}, {pipeline_mode = #tpu.pipeline_mode<synchronous>, transform_indices = @transform_7, window_bounds = array<i64: 2, 32>}, {pipeline_mode = #tpu.pipeline_mode<synchronous>, transform_indices = @transform_8, window_bounds = array<i64: 1, 32>}, {pipeline_mode = #tpu.pipeline_mode<synchronous>, transform_indices = @transform_9, window_bounds = array<i64: 1, 32>}, {pipeline_mode = #tpu.pipeline_mode<synchronous>, transform_indices = @transform_10, window_bounds = array<i64: 1, 32>}, {pipeline_mode = #tpu.pipeline_mode<synchronous>, transform_indices = @transform_11, window_bounds = array<i64: 1, 32, 1>}, {pipeline_mode = #tpu.pipeline_mode<synchronous>, transform_indices = @transform_12, window_bounds = array<i64: 1, 32, 1>}, {transform_indices = @transform_13, window_bounds = array<i64: 1, 2>}, {pipeline_mode = #tpu.pipeline_mode<synchronous>, transform_indices = @transform_14, window_bounds = array<i64: 2, 32, 256>}]} {
    %c0 = arith.constant 0 : index
    %c0_0 = arith.constant 0 : index
    %c0_1 = arith.constant 0 : index
    %0 = vector.load %arg1[%c0, %c0_0, %c0_1] : memref<2x32x256xf32, #tpu.memory_space<vmem>>, vector<2x32x256xf32>
    %cst = arith.constant dense<0.000000e+00> : vector<2x32xf32>
    %1 = vector.multi_reduction <add>, %0, %cst [2] : vector<2x32x256xf32> to vector<2x32xf32>
    %cst_2 = arith.constant 3.906250e-03 : f32
    %2 = vector.broadcast %cst_2 : f32 to vector<2x32xf32>
    %3 = arith.mulf %1, %2 : vector<2x32xf32>
    %4 = arith.mulf %0, %0 : vector<2x32x256xf32>
    %cst_3 = arith.constant dense<0.000000e+00> : vector<2x32xf32>
    %5 = vector.multi_reduction <add>, %4, %cst_3 [2] : vector<2x32x256xf32> to vector<2x32xf32>
    %cst_4 = arith.constant 3.906250e-03 : f32
    %6 = vector.broadcast %cst_4 : f32 to vector<2x32xf32>
    %7 = arith.mulf %5, %6 : vector<2x32xf32>
    %c0_5 = arith.constant 0 : index
    %c0_6 = arith.constant 0 : index
    %8 = vector.load %arg2[%c0_5, %c0_6] : memref<32x2xf32, #tpu.memory_space<vmem>>, vector<32x2xf32>
    %c0_7 = arith.constant 0 : index
    %c0_8 = arith.constant 0 : index
    %9 = vector.load %arg3[%c0_7, %c0_8] : memref<1x2xf32, #tpu.memory_space<vmem>>, vector<1x2xf32>
    %c0_9 = arith.constant 0 : index
    %c0_10 = arith.constant 0 : index
    %10 = vector.load %arg4[%c0_9, %c0_10] : memref<2x32xf32, #tpu.memory_space<vmem>>, vector<2x32xf32>
    %c0_11 = arith.constant 0 : index
    %c0_12 = arith.constant 0 : index
    %11 = vector.load %arg5[%c0_11, %c0_12] : memref<1x32xf32, #tpu.memory_space<vmem>>, vector<1x32xf32>
    %c0_13 = arith.constant 0 : index
    %c0_14 = arith.constant 0 : index
    %12 = vector.load %arg6[%c0_13, %c0_14] : memref<32x2xf32, #tpu.memory_space<vmem>>, vector<32x2xf32>
    %c0_15 = arith.constant 0 : index
    %c0_16 = arith.constant 0 : index
    %13 = vector.load %arg7[%c0_15, %c0_16] : memref<1x2xf32, #tpu.memory_space<vmem>>, vector<1x2xf32>
    %c0_17 = arith.constant 0 : index
    %c0_18 = arith.constant 0 : index
    %14 = vector.load %arg8[%c0_17, %c0_18] : memref<2x32xf32, #tpu.memory_space<vmem>>, vector<2x32xf32>
    %c0_19 = arith.constant 0 : index
    %c0_20 = arith.constant 0 : index
    %15 = vector.load %arg9[%c0_19, %c0_20] : memref<1x32xf32, #tpu.memory_space<vmem>>, vector<1x32xf32>
    %c0_21 = arith.constant 0 : index
    %c0_22 = arith.constant 0 : index
    %16 = vector.load %arg10[%c0_21, %c0_22] : memref<1x32xf32, #tpu.memory_space<vmem>>, vector<1x32xf32>
    %c0_23 = arith.constant 0 : index
    %c0_24 = arith.constant 0 : index
    %17 = vector.load %arg11[%c0_23, %c0_24] : memref<1x32xf32, #tpu.memory_space<vmem>>, vector<1x32xf32>
    %c0_25 = arith.constant 0 : index
    %c0_26 = arith.constant 0 : index
    %18 = memref.load %arg14[%c0_25, %c0_26] : memref<1x2xf32, #tpu.memory_space<smem>>
    %c0_27 = arith.constant 0 : index
    %c1 = arith.constant 1 : index
    %19 = memref.load %arg14[%c0_27, %c1] : memref<1x2xf32, #tpu.memory_space<smem>>
    %20 = vector.shape_cast %3 : vector<2x32xf32> to vector<2x32x1xf32>
    %21 = vector.shape_cast %8 : vector<32x2xf32> to vector<1x32x2xf32>
    %22 = vector.broadcast %20 : vector<2x32x1xf32> to vector<2x32x2xf32>
    %23 = vector.broadcast %21 : vector<1x32x2xf32> to vector<2x32x2xf32>
    %24 = arith.mulf %22, %23 : vector<2x32x2xf32>
    %cst_28 = arith.constant dense<0.000000e+00> : vector<2x2xf32>
    %25 = vector.multi_reduction <add>, %24, %cst_28 [1] : vector<2x32x2xf32> to vector<2x2xf32>
    %26 = vector.broadcast %9 : vector<1x2xf32> to vector<2x2xf32>
    %27 = arith.addf %25, %26 : vector<2x2xf32>
    %cst_29 = arith.constant 0.000000e+00 : f32
    %28 = vector.broadcast %cst_29 : f32 to vector<2x2xf32>
    %29 = arith.maximumf %27, %28 : vector<2x2xf32>
    %30 = vector.shape_cast %29 : vector<2x2xf32> to vector<2x2x1xf32>
    %31 = vector.shape_cast %10 : vector<2x32xf32> to vector<1x2x32xf32>
    %32 = vector.broadcast %30 : vector<2x2x1xf32> to vector<2x2x32xf32>
    %33 = vector.broadcast %31 : vector<1x2x32xf32> to vector<2x2x32xf32>
    %34 = arith.mulf %32, %33 : vector<2x2x32xf32>
    %cst_30 = arith.constant dense<0.000000e+00> : vector<2x32xf32>
    %35 = vector.multi_reduction <add>, %34, %cst_30 [1] : vector<2x2x32xf32> to vector<2x32xf32>
    %36 = vector.broadcast %11 : vector<1x32xf32> to vector<2x32xf32>
    %37 = arith.addf %35, %36 : vector<2x32xf32>
    %cst_31 = arith.constant 0.000000e+00 : f32
    %38 = vector.broadcast %cst_31 : f32 to vector<2x32xf32>
    %39 = arith.subf %38, %37 : vector<2x32xf32>
    %40 = math.exp %39 : vector<2x32xf32>
    %cst_32 = arith.constant 1.000000e+00 : f32
    %41 = vector.broadcast %cst_32 : f32 to vector<2x32xf32>
    %42 = arith.addf %41, %40 : vector<2x32xf32>
    %cst_33 = arith.constant 1.000000e+00 : f32
    %43 = vector.broadcast %cst_33 : f32 to vector<2x32xf32>
    %44 = arith.divf %43, %42 : vector<2x32xf32>
    %45 = vector.shape_cast %3 : vector<2x32xf32> to vector<2x32x1xf32>
    %46 = vector.shape_cast %12 : vector<32x2xf32> to vector<1x32x2xf32>
    %47 = vector.broadcast %45 : vector<2x32x1xf32> to vector<2x32x2xf32>
    %48 = vector.broadcast %46 : vector<1x32x2xf32> to vector<2x32x2xf32>
    %49 = arith.mulf %47, %48 : vector<2x32x2xf32>
    %cst_34 = arith.constant dense<0.000000e+00> : vector<2x2xf32>
    %50 = vector.multi_reduction <add>, %49, %cst_34 [1] : vector<2x32x2xf32> to vector<2x2xf32>
    %51 = vector.broadcast %13 : vector<1x2xf32> to vector<2x2xf32>
    %52 = arith.addf %50, %51 : vector<2x2xf32>
    %cst_35 = arith.constant 0.000000e+00 : f32
    %53 = vector.broadcast %cst_35 : f32 to vector<2x2xf32>
    %54 = arith.maximumf %52, %53 : vector<2x2xf32>
    %55 = vector.shape_cast %54 : vector<2x2xf32> to vector<2x2x1xf32>
    %56 = vector.shape_cast %14 : vector<2x32xf32> to vector<1x2x32xf32>
    %57 = vector.broadcast %55 : vector<2x2x1xf32> to vector<2x2x32xf32>
    %58 = vector.broadcast %56 : vector<1x2x32xf32> to vector<2x2x32xf32>
    %59 = arith.mulf %57, %58 : vector<2x2x32xf32>
    %cst_36 = arith.constant dense<0.000000e+00> : vector<2x32xf32>
    %60 = vector.multi_reduction <add>, %59, %cst_36 [1] : vector<2x2x32xf32> to vector<2x32xf32>
    %61 = vector.broadcast %15 : vector<1x32xf32> to vector<2x32xf32>
    %62 = arith.addf %60, %61 : vector<2x32xf32>
    %cst_37 = arith.constant 0.000000e+00 : f32
    %63 = vector.broadcast %cst_37 : f32 to vector<2x32xf32>
    %64 = arith.subf %63, %62 : vector<2x32xf32>
    %65 = math.exp %64 : vector<2x32xf32>
    %cst_38 = arith.constant 1.000000e+00 : f32
    %66 = vector.broadcast %cst_38 : f32 to vector<2x32xf32>
    %67 = arith.addf %66, %65 : vector<2x32xf32>
    %cst_39 = arith.constant 1.000000e+00 : f32
    %68 = vector.broadcast %cst_39 : f32 to vector<2x32xf32>
    %69 = arith.divf %68, %67 : vector<2x32xf32>
    %cst_40 = arith.constant 1.000000e+00 : f32
    %70 = vector.broadcast %cst_40 : f32 to vector<2x32xf32>
    %71 = arith.addf %70, %44 : vector<2x32xf32>
    %72 = vector.broadcast %18 : f32 to vector<2x32xf32>
    %73 = arith.mulf %72, %71 : vector<2x32xf32>
    %cst_41 = arith.constant 1.000000e+00 : f32
    %74 = vector.broadcast %cst_41 : f32 to vector<2x32xf32>
    %75 = arith.addf %74, %69 : vector<2x32xf32>
    %76 = vector.broadcast %19 : f32 to vector<2x32xf32>
    %77 = arith.mulf %76, %75 : vector<2x32xf32>
    %78 = arith.mulf %77, %3 : vector<2x32xf32>
    %cst_42 = arith.constant dense<0.000000e+00> : vector<32xf32>
    %79 = vector.multi_reduction <add>, %78, %cst_42 [0] : vector<2x32xf32> to vector<32xf32>
    %80 = vector.shape_cast %79 : vector<32xf32> to vector<1x32xf32>
    %cst_43 = arith.constant 5.000000e-01 : f32
    %81 = vector.broadcast %cst_43 : f32 to vector<1x32xf32>
    %82 = arith.mulf %80, %81 : vector<1x32xf32>
    %cst_44 = arith.constant 1.000000e+00 : f32
    %83 = vector.broadcast %cst_44 : f32 to vector<1x32xf32>
    %84 = arith.subf %83, %82 : vector<1x32xf32>
    %cst_45 = arith.constant 2.000000e+00 : f32
    %85 = vector.broadcast %cst_45 : f32 to vector<2x32xf32>
    %86 = arith.mulf %85, %77 : vector<2x32xf32>
    %87 = arith.mulf %86, %3 : vector<2x32xf32>
    %cst_46 = arith.constant 1.000000e+00 : f32
    %88 = vector.broadcast %cst_46 : f32 to vector<2x32xf32>
    %89 = arith.subf %88, %87 : vector<2x32xf32>
    %90 = arith.mulf %77, %77 : vector<2x32xf32>
    %91 = arith.mulf %90, %7 : vector<2x32xf32>
    %92 = arith.addf %89, %91 : vector<2x32xf32>
    %cst_47 = arith.constant dense<0.000000e+00> : vector<32xf32>
    %93 = vector.multi_reduction <add>, %92, %cst_47 [0] : vector<2x32xf32> to vector<32xf32>
    %94 = vector.shape_cast %93 : vector<32xf32> to vector<1x32xf32>
    %cst_48 = arith.constant 5.000000e-01 : f32
    %95 = vector.broadcast %cst_48 : f32 to vector<1x32xf32>
    %96 = arith.mulf %94, %95 : vector<1x32xf32>
    %97 = arith.mulf %84, %84 : vector<1x32xf32>
    %98 = arith.subf %96, %97 : vector<1x32xf32>
    %cst_49 = arith.constant 0.000000e+00 : f32
    %99 = vector.broadcast %cst_49 : f32 to vector<1x32xf32>
    %100 = arith.maximumf %98, %99 : vector<1x32xf32>
    %cst_50 = arith.constant 9.99999974E-6 : f32
    %101 = vector.broadcast %cst_50 : f32 to vector<1x32xf32>
    %102 = arith.addf %100, %101 : vector<1x32xf32>
    %103 = math.rsqrt %102 : vector<1x32xf32>
    %104 = arith.mulf %103, %16 : vector<1x32xf32>
    %cst_51 = arith.constant 1.000000e+00 : f32
    %105 = vector.broadcast %cst_51 : f32 to vector<1x32xf32>
    %106 = arith.subf %105, %84 : vector<1x32xf32>
    %107 = arith.mulf %106, %104 : vector<1x32xf32>
    %108 = arith.addf %107, %17 : vector<1x32xf32>
    %109 = vector.broadcast %104 : vector<1x32xf32> to vector<2x32xf32>
    %110 = arith.mulf %77, %109 : vector<2x32xf32>
    %cst_52 = arith.constant 0.000000e+00 : f32
    %111 = vector.broadcast %cst_52 : f32 to vector<2x32xf32>
    %112 = arith.subf %111, %110 : vector<2x32xf32>
    %113 = vector.shape_cast %73 : vector<2x32xf32> to vector<2x32x1xf32>
    %114 = vector.broadcast %113 : vector<2x32x1xf32> to vector<2x32x256xf32>
    %115 = arith.mulf %114, %0 : vector<2x32x256xf32>
    %116 = vector.shape_cast %108 : vector<1x32xf32> to vector<1x32x1xf32>
    %117 = vector.shape_cast %112 : vector<2x32xf32> to vector<2x32x1xf32>
    %118 = vector.broadcast %117 : vector<2x32x1xf32> to vector<2x32x256xf32>
    %119 = arith.mulf %118, %0 : vector<2x32x256xf32>
    %120 = vector.broadcast %116 : vector<1x32x1xf32> to vector<2x32x256xf32>
    %121 = arith.addf %120, %119 : vector<2x32x256xf32>
    %cst_53 = arith.constant 0.000000e+00 : f32
    %122 = vector.broadcast %cst_53 : f32 to vector<2x32x256xf32>
    %123 = arith.maximumf %121, %122 : vector<2x32x256xf32>
    %124 = arith.addf %115, %123 : vector<2x32x256xf32>
    %cst_54 = arith.constant dense<0.000000e+00> : vector<2x32xf32>
    %125 = vector.multi_reduction <add>, %124, %cst_54 [2] : vector<2x32x256xf32> to vector<2x32xf32>
    %126 = vector.shape_cast %125 : vector<2x32xf32> to vector<2x32x1xf32>
    %cst_55 = arith.constant dense<0.000000e+00> : vector<32x1xf32>
    %127 = vector.multi_reduction <add>, %126, %cst_55 [0] : vector<2x32x1xf32> to vector<32x1xf32>
    %128 = vector.shape_cast %127 : vector<32x1xf32> to vector<1x32x1xf32>
    %129 = arith.mulf %124, %124 : vector<2x32x256xf32>
    %cst_56 = arith.constant dense<0.000000e+00> : vector<2x32xf32>
    %130 = vector.multi_reduction <add>, %129, %cst_56 [2] : vector<2x32x256xf32> to vector<2x32xf32>
    %131 = vector.shape_cast %130 : vector<2x32xf32> to vector<2x32x1xf32>
    %cst_57 = arith.constant dense<0.000000e+00> : vector<32x1xf32>
    %132 = vector.multi_reduction <add>, %131, %cst_57 [0] : vector<2x32x1xf32> to vector<32x1xf32>
    %133 = vector.shape_cast %132 : vector<32x1xf32> to vector<1x32x1xf32>
    %cst_58 = arith.constant 0.001953125 : f32
    %134 = vector.broadcast %cst_58 : f32 to vector<1x32x1xf32>
    %135 = arith.mulf %128, %134 : vector<1x32x1xf32>
    %cst_59 = arith.constant 0.001953125 : f32
    %136 = vector.broadcast %cst_59 : f32 to vector<1x32x1xf32>
    %137 = arith.mulf %133, %136 : vector<1x32x1xf32>
    %138 = arith.mulf %135, %135 : vector<1x32x1xf32>
    %139 = arith.subf %137, %138 : vector<1x32x1xf32>
    %cst_60 = arith.constant 0.000000e+00 : f32
    %140 = vector.broadcast %cst_60 : f32 to vector<1x32x1xf32>
    %141 = arith.maximumf %139, %140 : vector<1x32x1xf32>
    %cst_61 = arith.constant 9.99999974E-6 : f32
    %142 = vector.broadcast %cst_61 : f32 to vector<1x32x1xf32>
    %143 = arith.addf %141, %142 : vector<1x32x1xf32>
    %144 = math.rsqrt %143 : vector<1x32x1xf32>
    %c0_62 = arith.constant 0 : index
    %c0_63 = arith.constant 0 : index
    %c0_64 = arith.constant 0 : index
    %145 = vector.load %arg12[%c0_62, %c0_63, %c0_64] : memref<1x32x1xf32, #tpu.memory_space<vmem>>, vector<1x32x1xf32>
    %146 = arith.mulf %144, %145 : vector<1x32x1xf32>
    %c0_65 = arith.constant 0 : index
    %c0_66 = arith.constant 0 : index
    %c0_67 = arith.constant 0 : index
    %147 = vector.load %arg13[%c0_65, %c0_66, %c0_67] : memref<1x32x1xf32, #tpu.memory_space<vmem>>, vector<1x32x1xf32>
    %148 = arith.mulf %135, %146 : vector<1x32x1xf32>
    %149 = arith.subf %147, %148 : vector<1x32x1xf32>
    %150 = vector.broadcast %146 : vector<1x32x1xf32> to vector<2x32x256xf32>
    %151 = arith.mulf %124, %150 : vector<2x32x256xf32>
    %152 = vector.broadcast %149 : vector<1x32x1xf32> to vector<2x32x256xf32>
    %153 = arith.addf %151, %152 : vector<2x32x256xf32>
    %cst_68 = arith.constant 0.000000e+00 : f32
    %154 = vector.broadcast %cst_68 : f32 to vector<2x32x256xf32>
    %155 = arith.maximumf %153, %154 : vector<2x32x256xf32>
    %c0_69 = arith.constant 0 : index
    %c0_70 = arith.constant 0 : index
    %c0_71 = arith.constant 0 : index
    %156 = vector.load %arg15[%c0_69, %c0_70, %c0_71] : memref<2x32x256xf32, #tpu.memory_space<vmem>>, vector<2x32x256xf32>
    tpu.vector_store %arg15[%c0_69, %c0_70, %c0_71], %155 {strides = array<i32>} : memref<2x32x256xf32, #tpu.memory_space<vmem>>, vector<2x32x256xf32>,
    return
  }
  func.func @transform_0(%arg0: i32) -> (i32, i32, i32) {
    %c0_i32 = arith.constant 0 : i32
    %c0_i32_0 = arith.constant 0 : i32
    %c0_i32_1 = arith.constant 0 : i32
    %c0_i32_2 = arith.constant 0 : i32
    return %c0_i32, %c0_i32_0, %c0_i32_1 : i32, i32, i32
  }
  func.func @transform_1(%arg0: i32) -> (i32, i32) {
    %c0_i32 = arith.constant 0 : i32
    %c0_i32_0 = arith.constant 0 : i32
    %c0_i32_1 = arith.constant 0 : i32
    return %c0_i32, %c0_i32_0 : i32, i32
  }
  func.func @transform_2(%arg0: i32) -> (i32, i32) {
    %c0_i32 = arith.constant 0 : i32
    %c0_i32_0 = arith.constant 0 : i32
    %c0_i32_1 = arith.constant 0 : i32
    return %c0_i32, %c0_i32_0 : i32, i32
  }
  func.func @transform_3(%arg0: i32) -> (i32, i32) {
    %c0_i32 = arith.constant 0 : i32
    %c0_i32_0 = arith.constant 0 : i32
    %c0_i32_1 = arith.constant 0 : i32
    return %c0_i32, %c0_i32_0 : i32, i32
  }
  func.func @transform_4(%arg0: i32) -> (i32, i32) {
    %c0_i32 = arith.constant 0 : i32
    %c0_i32_0 = arith.constant 0 : i32
    %c0_i32_1 = arith.constant 0 : i32
    return %c0_i32, %c0_i32_0 : i32, i32
  }
  func.func @transform_5(%arg0: i32) -> (i32, i32) {
    %c0_i32 = arith.constant 0 : i32
    %c0_i32_0 = arith.constant 0 : i32
    %c0_i32_1 = arith.constant 0 : i32
    return %c0_i32, %c0_i32_0 : i32, i32
  }
  func.func @transform_6(%arg0: i32) -> (i32, i32) {
    %c0_i32 = arith.constant 0 : i32
    %c0_i32_0 = arith.constant 0 : i32
    %c0_i32_1 = arith.constant 0 : i32
    return %c0_i32, %c0_i32_0 : i32, i32
  }
  func.func @transform_7(%arg0: i32) -> (i32, i32) {
    %c0_i32 = arith.constant 0 : i32
    %c0_i32_0 = arith.constant 0 : i32
    %c0_i32_1 = arith.constant 0 : i32
    return %c0_i32, %c0_i32_0 : i32, i32
  }
  func.func @transform_8(%arg0: i32) -> (i32, i32) {
    %c0_i32 = arith.constant 0 : i32
    %c0_i32_0 = arith.constant 0 : i32
    %c0_i32_1 = arith.constant 0 : i32
    return %c0_i32, %c0_i32_0 : i32, i32
  }
  func.func @transform_9(%arg0: i32) -> (i32, i32) {
    %c0_i32 = arith.constant 0 : i32
    %c0_i32_0 = arith.constant 0 : i32
    %c0_i32_1 = arith.constant 0 : i32
    return %c0_i32, %c0_i32_0 : i32, i32
  }
  func.func @transform_10(%arg0: i32) -> (i32, i32) {
    %c0_i32 = arith.constant 0 : i32
    %c0_i32_0 = arith.constant 0 : i32
    %c0_i32_1 = arith.constant 0 : i32
    return %c0_i32, %c0_i32_0 : i32, i32
  }
  func.func @transform_11(%arg0: i32) -> (i32, i32, i32) {
    %c0_i32 = arith.constant 0 : i32
    %c0_i32_0 = arith.constant 0 : i32
    %c0_i32_1 = arith.constant 0 : i32
    %c0_i32_2 = arith.constant 0 : i32
    return %c0_i32, %c0_i32_0, %c0_i32_1 : i32, i32, i32
  }
  func.func @transform_12(%arg0: i32) -> (i32, i32, i32) {
    %c0_i32 = arith.constant 0 : i32
    %c0_i32_0 = arith.constant 0 : i32
    %c0_i32_1 = arith.constant 0 : i32
    %c0_i32_2 = arith.constant 0 : i32
    return %c0_i32, %c0_i32_0, %c0_i32_1 : i32, i32, i32
  }
  func.func @transform_13(%arg0: i32) -> (i32, i32) {
    %c0_i32 = arith.constant 0 : i32
    %c0_i32_0 = arith.constant 0 : i32
    %c0_i32_1 = arith.constant 0 : i32
    return %c0_i32, %c0_i32_0 : i32, i32
  }
  func.func @transform_14(%arg0: i32) -> (i32, i32, i32) {
    %c0_i32 = arith.constant 0 : i32
    %c0_i32_0 = arith.constant 0 : i32
    %c0_i32_1 = arith.constant 0 : i32
    %c0_i32_2 = arith.constant 0 : i32
    return %c0_i32, %c0_i32_0, %c0_i32_1 : i32, i32, i32
  }
}

</mosaic_0001>

<bundles_post_ra>
// kernel: _lambda_.1
= control target key start
LH: loop header
LB: loop body
LE: loop exit
PB: predicated region body
PF: predicated region fallthrough
CT: control target
= control target key end

     0   :  { %19 = vsyncpa [#allocation3], 0  ;;  %s1609_s0 = inlined_call_operand.vmem [shape: f32[2,32,256], index: 0, kind: input, shape index: {}]   ;;  %s1610_s1 = inlined_call_operand.vmem [shape: f32[32,2], index: 1, kind: input, shape index: {}]   ;;  %s1611_s2 = inlined_call_operand.vmem [shape: f32[1,2], index: 2, kind: input, shape index: {}]   ;;  %s1612_s3 = inlined_call_operand.vmem [shape: f32[2,32], index: 3, kind: input, shape index: {}]   ;;  %s1613_s4 = inlined_call_operand.vmem [shape: f32[1,32], index: 4, kind: input, shape index: {}]   ;;  %s1614_s5 = inlined_call_operand.vmem [shape: f32[32,2], index: 5, kind: input, shape index: {}]   ;;  %s1615_s6 = inlined_call_operand.vmem [shape: f32[1,2], index: 6, kind: input, shape index: {}]   ;;  %s1616_s7 = inlined_call_operand.vmem [shape: f32[2,32], index: 7, kind: input, shape index: {}]   ;;  %s1617_s8 = inlined_call_operand.vmem [shape: f32[1,32], index: 8, kind: input, shape index: {}]   ;;  %s1618_s9 = inlined_call_operand.vmem [shape: f32[1,32], index: 9, kind: input, shape index: {}]   ;;  %s1619_s10 = inlined_call_operand.vmem [shape: f32[1,32], index: 10, kind: input, shape index: {}]   ;;  %s1620_s11 = inlined_call_operand.vmem [shape: f32[1,32,1], index: 11, kind: input, shape index: {}]   ;;  %s1621_s12 = inlined_call_operand.vmem [shape: f32[1,32,1], index: 12, kind: input, shape index: {}]   ;;  %s1622_s13 = inlined_call_operand.vmem [shape: f32[1,2], index: 13, kind: input, shape index: {}]   ;;  %s1623_s14 = inlined_call_operand.vmem [shape: f32[2,32,256], index: 14, kind: output, shape index: {}]  }
   0x1   :  { %s52_s15 = sshll.u32 %s1622_s13, 4  ;;  %s53_s15 = int_to_ptr.vmem [resolvable:$true] %s52_s15 }
   0x2   :  { %s976_s16 = scalar_lea.vmem %s53_s15, 16  ;;  %p981_p1 = scmp.lt.s32.totalorder %s53_s15, %s53_s15 }
   0x3   :  { %p977_p0 = scmp.ne.s32.totalorder %s53_s15, %s976_s16  ;;  %p982_p2 = scmp.lt.s32.totalorder %s976_s16, %s976_s16 }
   0x5   :  { %p983_p3 = por %p982_p2, %p981_p1 }
   0x7   :  { %p984_p4 = pnand %p983_p3, %p977_p0 }
   0x9   :  { %987 = shalt.err (!%p984_p4)
}
   0xa   :  { %s990_s17 = smov [#allocation2]  }
   0xb   :  { %55 = dma.vmem_to_smem %s53_s15, 16, %s990_s17, [#allocation3]  }
   0xc   :  { %988 = dma.done.wait [#allocation3], 16  }
   0xd   :  { %989 = vsyncadd [#allocation3], 4294967280 }
   0xe   :  { %59 = sfence }
   0xf   :  { %v1073_v0 = vld [vmem:[%s1609_s0 + $0x40] sm:$0xff]  ;;  %v1078_v1 = vld [vmem:[%s1609_s0 + $0x48] sm:$0xff]  ;;  %v219_v3 = vlaneseq  ;;  %v1095_v6 = vld [vmem:[%s1609_s0 + $0x50] sm:$0xff]  ;;  %vm393_vm0 = vcmask 130112   ;;  %vm182_vm1 = vcmask 15360   ;;  %vm400_vm2 = vcmask 195712  }
  0x10   :  { %v1083_v2 = vld [vmem:[%s1609_s0] sm:$0xff]  ;;  %v88_v4 = vadd.f32 %v1078_v1, %v1073_v0  ;;  %v1090_v5 = vld [vmem:[%s1609_s0 + $0x8] sm:$0xff]  ;;  %v1100_v7 = vld [vmem:[%s1609_s0 + $0x58] sm:$0xff]  ;;  %v116_v27 = vmul.f32 %v1073_v0, %v1073_v0  ;;  %v117_v28 = vmul.f32 %v1078_v1, %v1078_v1  ;;  %v118_v31 = vmul.f32 %v1095_v6, %v1095_v6 }
  0x11   :  { %v76_v8 = vadd.f32 %v1090_v5, %v1083_v2  ;;  %v1107_v9 = vld [vmem:[%s1609_s0 + $0x10] sm:$0xff]  ;;  %v1112_v10 = vld [vmem:[%s1609_s0 + $0x18] sm:$0xff]  ;;  %v1114_v11 = vshrl.u32 %v219_v3, 7  ;;  %v383_v12 = vand.u32 127, %v219_v3  ;;  %v91_v13 = vadd.f32 %v1100_v7, %v1095_v6  ;;  %v1123_v15 = vld [vmem:[%s1609_s0 + $0x60] sm:$0xff] }
  0x12   :  { %89 = vadd.xlane.f32.xlu0 %v88_v4  ;;  %v79_v14 = vadd.f32 %v1112_v10, %v1107_v9  ;;  %v1128_v16 = vld [vmem:[%s1609_s0 + $0x68] sm:$0xff]  ;;  %v1136_v18 = vld [vmem:[%s1609_s0 + $0x20] sm:$0xff]  ;;  %v1150_v22 = vld [vmem:[%s1609_s0 + $0x70] sm:$0xff]  ;;  %v136_v30 = vadd.f32 %v117_v28, %v116_v27  ;;  %v119_v32 = vmul.f32 %v1100_v7, %v1100_v7  ;;  %v108_v33 = vmul.f32 %v1083_v2, %v1083_v2 }
  0x13   :  { %77 = vadd.xlane.f32.xlu1 %v76_v8  ;;  %v1131_v17 = vsub.s32 %v383_v12, %v1114_v11  ;;  %v1141_v19 = vld [vmem:[%s1609_s0 + $0x28] sm:$0xff]  ;;  %v94_v20 = vadd.f32 %v1128_v16, %v1123_v15  ;;  %v1155_v23 = vld [vmem:[%s1609_s0 + $0x78] sm:$0xff]  ;;  %v1160_v24 = vld [vmem:[%s1609_s0 + $0x30] sm:$0xff]  ;;  %v109_v34 = vmul.f32 %v1090_v5, %v1090_v5  ;;  %v388_v37 = vadd.s32 4294967288, %v383_v12 }
  0x14   :  { %v82_v21 = vadd.f32 %v1141_v19, %v1136_v18  ;;  %v1165_v25 = vld [vmem:[%s1609_s0 + $0x38] sm:$0xff]  ;;  %v97_v26 = vadd.f32 %v1155_v23, %v1150_v22  ;;  %v139_v35 = vadd.f32 %v119_v32, %v118_v31  ;;  %v120_v38 = vmul.f32 %v1123_v15, %v1123_v15  ;;  %v164_v56 = vld [vmem:[%s1614_s5 + $0x8] sm:$0xff]  ;;  %v163_v59 = vld [vmem:[%s1614_s5] sm:$0xff] }
  0x15   :  { %v85_v29 = vadd.f32 %v1165_v25, %v1160_v24  ;;  %v124_v36 = vadd.f32 %v109_v34, %v108_v33  ;;  %v121_v39 = vmul.f32 %v1128_v16, %v1128_v16  ;;  %v122_v40 = vmul.f32 %v1150_v22, %v1150_v22  ;;  %v166_v34 = vld [vmem:[%s1614_s5 + $0x18] sm:$0xff] }
  0x16   :  { %92 = vadd.xlane.f32.xlu0 %v91_v13  ;;  %v123_v41 = vmul.f32 %v1155_v23, %v1155_v23  ;;  %v1192_v42 = vsub.s32 %v388_v37, %v1114_v11  ;;  %v395_v45 = vadd.s32 4294967280, %v383_v12  ;;  %v402_v47 = vadd.s32 4294967272, %v383_v12  ;;  %v165_v13 = vld [vmem:[%s1614_s5 + $0x10] sm:$0xff] }
  0x17   :  { %80 = vadd.xlane.f32.xlu1 %v79_v14  ;;  %v142_v43 = vadd.f32 %v121_v39, %v120_v38  ;;  %vm407_vm3 = vcmask 261312   ;;  %vm235_vm4 = vcmask 254976   ;;  %vm435_vm5 = vcmask 1041409  }
  0x18   :  { %v145_v44 = vadd.f32 %v123_v41, %v122_v40  ;;  %v1195_v46 = vsub.s32 %v395_v45, %v1114_v11  ;;  %v1198_v48 = vsub.s32 %v402_v47, %v1114_v11 }
  0x1a   :  { %95 = vadd.xlane.f32.xlu0 %v94_v20 }
  0x1b   :  { %83 = vadd.xlane.f32.xlu1 %v82_v21 }
  0x1e   :  { %98 = vadd.xlane.f32.xlu0 %v97_v26 }
  0x1f   :  { %86 = vadd.xlane.f32.xlu1 %v85_v29 }
  0x22   :  { %140 = vadd.xlane.f32.xlu0 %v139_v35 }
  0x23   :  { %137 = vadd.xlane.f32.xlu1 %v136_v30 }
  0x26   :  { %143 = vadd.xlane.f32.xlu0 %v142_v43 }
  0x27   :  { %125 = vadd.xlane.f32.xlu1 %v124_v36 }
  0x2b   :  { %146 = vadd.xlane.f32.xlu1 %v145_v44 }
  0x9f   :  { %v90_v49 = vpop.xlane.xlu0 %89 }
  0xa0   :  { %v1200_v50 = vmul.f32 0.00390625, %v90_v49  ;;  %v78_v51 = vpop.xlane.xlu1 %77 }
  0xa1   :  { %v1202_v52 = vmul.f32 0.00390625, %v78_v51 }
  0xa2   :  { %v412_v53 = vrot.slane %v1200_v50, %v1131_v17  ;;  %v274_v21 = vmul.f32 %v163_v59, %v1200_v50 }
  0xa3   :  { %v387_v54 = vrot.slane %v1202_v52, %v1131_v17  ;;  %v93_v55 = vpop.xlane.xlu0 %92  ;;  %v270_v61 = vmul.f32 %v163_v59, %v1202_v52 }
  0xa4   :  { %v1211_v57 = vmul.f32 0.00390625, %v93_v55  ;;  %v81_v58 = vpop.xlane.xlu1 %80  ;;  %v291_v37 = vsel %vm182_vm1, %v274_v21, 0.0 }
  0xa5   :  { %v1216_v60 = vmul.f32 0.00390625, %v81_v58  ;;  %v278_v26 = vsel %vm182_vm1, %v270_v61, 0.0 }
  0xa6   :  { %v416_v62 = vrot.slane %v1211_v57, %v1192_v42  ;;  %v275_v63 = vmul.f32 %v164_v56, %v1211_v57 }
  0xa7   :  { %v271_v3 = vmul.f32 %v164_v56, %v1216_v60  ;;  %v392_v4 = vrot.slane %v1216_v60, %v1192_v42  ;;  %v96_v8 = vpop.xlane.xlu0 %95 }
  0xa8   :  { %v417_v12 = vsel %vm393_vm0, %v416_v62, %v412_v53  ;;  %v1229_v14 = vmul.f32 0.00390625, %v96_v8  ;;  %v84_v20 = vpop.xlane.xlu1 %83  ;;  %v292_v29 = vsel %vm182_vm1, %v275_v63, 0.0 }
  0xa9   :  { %v279_v27 = vsel %vm182_vm1, %v271_v3, 0.0  ;;  %v394_v28 = vsel %vm393_vm0, %v392_v4, %v387_v54  ;;  %v1239_v32 = vmul.f32 0.00390625, %v84_v20  ;;  %v293_v41 = vadd.f32 %v292_v29, %v291_v37 }
  0xaa   :  { %v276_v30 = vmul.f32 %v165_v13, %v1229_v14  ;;  %v421_v31 = vrot.slane %v1229_v14, %v1195_v46  ;;  %v280_v38 = vadd.f32 %v279_v27, %v278_v26 }
  0xab   :  { %v99_v33 = vpop.xlane.xlu0 %98  ;;  %v272_v43 = vmul.f32 %v165_v13, %v1239_v32  ;;  %v399_v44 = vrot.slane %v1239_v32, %v1195_v46 }
  0xac   :  { %v1244_v35 = vmul.f32 0.00390625, %v99_v33  ;;  %v87_v36 = vpop.xlane.xlu1 %86  ;;  %v294_v39 = vsel %vm182_vm1, %v276_v30, 0.0  ;;  %v422_v40 = vsel %vm400_vm2, %v421_v31, %v417_v12 }
  0xad   :  { %v1255_v49 = vmul.f32 0.00390625, %v87_v36  ;;  %v295_v51 = vadd.f32 %v294_v39, %v293_v41  ;;  %v281_v53 = vsel %vm182_vm1, %v272_v43, 0.0  ;;  %v401_v54 = vsel %vm400_vm2, %v399_v44, %v394_v28 }
  0xae   :  { %v277_v45 = vmul.f32 %v166_v34, %v1244_v35  ;;  %v426_v47 = vrot.slane %v1244_v35, %v1198_v48  ;;  %v282_v58 = vadd.f32 %v281_v53, %v280_v38 }
  0xaf   :  { %v141_v56 = vpop.xlane.xlu0 %140  ;;  %v273_v63 = vmul.f32 %v166_v34, %v1255_v49  ;;  %v406_v3 = vrot.slane %v1255_v49, %v1198_v48 }
  0xb0   :  { %v138_v55 = vpop.xlane.xlu1 %137  ;;  %v296_v59 = vsel %vm182_vm1, %v277_v45, 0.0  ;;  %v1261_v61 = vsel %vm407_vm3, %v426_v47, %v422_v40  ;;  %v153_v8 = vmul.f32 0.00390625, %v141_v56 }
  0xb1   :  { %v297_v62 = vadd.f32 %v296_v59, %v295_v51  ;;  %v152_v4 = vmul.f32 0.00390625, %v138_v55  ;;  %v283_v13 = vsel %vm182_vm1, %v273_v63, 0.0  ;;  %v1268_v20 = vsel %vm407_vm3, %v406_v3, %v401_v54  ;;  %v944_v51 = vld [vmem:[%s1615_s6] ss:$0 sm:$0xff] }
  0xb2   :  { %v284_v26 = vadd.f32 %v283_v13, %v282_v58  ;;  %v489_v30 = vrot.slane %v153_v8, %v1192_v42  ;;  %v1285_v58 = vsub.s32 0, %v1114_v11  ;;  %v156_v13 = vld [vmem:[%s1610_s1] sm:$0xff] }
  0xb3   :  { %v298_v12 = vrot.slane %v297_v62, 4  ;;  %v485_v27 = vrot.slane %v152_v4, %v1131_v17  ;;  %v144_v28 = vpop.xlane.xlu0 %143  ;;  %v174_v11 = vmul.f32 %v156_v13, %v1202_v52  ;;  %v178_v52 = vmul.f32 %v156_v13, %v1200_v50 }
  0xb4   :  { %v1270_v21 = vpop.xlane.xlu1 %125  ;;  %v154_v31 = vmul.f32 0.00390625, %v144_v28  ;;  %v285_v33 = vrot.slane %v284_v26, 4  ;;  %v158_v28 = vld [vmem:[%s1610_s1 + $0x10] sm:$0xff] }
  0xb5   :  { %v299_v29 = vadd.f32 %v298_v12, %v297_v62  ;;  %v490_v36 = vsel %vm393_vm0, %v489_v30, %v485_v27  ;;  %v183_v30 = vsel %vm182_vm1, %v174_v11, 0.0 }
  0xb6   :  { %v494_v37 = vrot.slane %v154_v31, %v1195_v46  ;;  %v286_v39 = vadd.f32 %v285_v33, %v284_v26  ;;  %v157_v26 = vld [vmem:[%s1610_s1 + $0x8] sm:$0xff]  ;;  %v176_v33 = vmul.f32 %v158_v28, %v1239_v32 }
  0xb7   :  { %v300_v34 = vrot.slane %v299_v29, 2  ;;  %v175_v27 = vmul.f32 %v157_v26, %v1216_v60  ;;  %v180_v60 = vmul.f32 %v158_v28, %v1229_v14 }
  0xb8   :  { %v147_v38 = vpop.xlane.xlu1 %146  ;;  %v495_v43 = vsel %vm400_vm2, %v494_v37, %v490_v36  ;;  %v287_v44 = vrot.slane %v286_v39, 2 }
  0xb9   :  { %v155_v40 = vmul.f32 0.00390625, %v147_v38  ;;  %v301_v41 = vadd.f32 %v300_v34, %v299_v29  ;;  %v179_v29 = vmul.f32 %v157_v26, %v1211_v57  ;;  %v184_v31 = vsel %vm182_vm1, %v175_v27, 0.0  ;;  %v159_v34 = vld [vmem:[%s1610_s1 + $0x18] sm:$0xff] }
  0xba   :  { %v288_v53 = vadd.f32 %v287_v44, %v286_v39  ;;  %v185_v37 = vadd.f32 %v184_v31, %v183_v30  ;;  %v181_v38 = vmul.f32 %v159_v34, %v1244_v35  ;;  %v186_v57 = vsel %vm182_vm1, %v176_v33, 0.0  ;;  %v942_v31 = vld [vmem:[%s1611_s2] ss:$0 sm:$0xff] }
  0xbb   :  { %v499_v45 = vrot.slane %v155_v40, %v1198_v48  ;;  %v302_v47 = vrot.slane %v301_v41, 1  ;;  %v197_v36 = vsel %vm182_vm1, %v179_v29, 0.0  ;;  %v177_v39 = vmul.f32 %v159_v34, %v1255_v49 }
  0xbc   :  { %v289_v56 = vrot.slane %v288_v53, 1  ;;  %v196_v40 = vsel %vm182_vm1, %v178_v52, 0.0  ;;  %v199_v32 = vsel %vm182_vm1, %v180_v60, 0.0  ;;  %v201_v44 = vsel %vm182_vm1, %v181_v38, 0.0 }
  0xbd   :  { %v1282_v54 = vsel %vm407_vm3, %v499_v45, %v495_v43  ;;  %v303_v55 = vadd.f32 %v302_v47, %v301_v41  ;;  %v198_v41 = vadd.f32 %v197_v36, %v196_v40  ;;  %v187_v43 = vadd.f32 %v186_v57, %v185_v37  ;;  %v168_v57 = vld [vmem:[%s1616_s7] sm:$0x3]  ;;  %s941_s7 = sld [smem:[#allocation2 + $0x1]] }
  0xbe   :  { %v290_v62 = vadd.f32 %v289_v56, %v288_v53  ;;  %v188_v14 = vsel %vm182_vm1, %v177_v39, 0.0  ;;  %v110_v35 = vmul.f32 %v1107_v9, %v1107_v9  ;;  %v111_v49 = vmul.f32 %v1112_v10, %v1112_v10 }
  0xbf   :  { %v311_v59 = vadd.f32 %v944_v51, %v303_v55  ;;  %v200_v50 = vadd.f32 %v199_v32, %v198_v41  ;;  %v189_v47 = vadd.f32 %v188_v14, %v187_v43 }
  0xc0   :  { %v310_v3 = vadd.f32 %v944_v51, %v290_v62  ;;  %v127_v56 = vadd.f32 %v111_v49, %v110_v35  ;;  %v113_v62 = vmul.f32 %v1141_v19, %v1141_v19 }
  0xc1   :  { %v313_v63 = vmax.f32 %v311_v59, 0.0  ;;  %v202_v45 = vadd.f32 %v201_v44, %v200_v50  ;;  %v190_v53 = vrot.slane %v189_v47, 4  ;;  %v112_v59 = vmul.f32 %v1136_v18, %v1136_v18 }
  0xc2   :  { %v312_v8 = vmax.f32 %v310_v3, 0.0 }
  0xc3   :  { %v324_v4 = vrot.slane %v313_v63, %v1285_v58  ;;  %v203_v51 = vrot.slane %v202_v45, 4  ;;  %v191_v63 = vadd.f32 %v190_v53, %v189_v47 }
  0xc4   :  { %v317_v12 = vrot.slane %v312_v8, %v1285_v58  ;;  %v114_v8 = vmul.f32 %v1160_v24, %v1160_v24 }
  0xc5   :  { %326 = vbcast.lane.b32.xlu0 %v324_v4, 256  ;;  %v204_v55 = vadd.f32 %v203_v51, %v202_v45  ;;  %v130_v4 = vadd.f32 %v113_v62, %v112_v59  ;;  %v192_v13 = vrot.slane %v191_v63, 2 }
  0xc6   :  { %319 = vbcast.lane.b32.xlu1 %v317_v12, 256  ;;  %v115_v12 = vmul.f32 %v1165_v25, %v1165_v25 }
  0xc7   :  { %v205_v3 = vrot.slane %v204_v55, 2  ;;  %v193_v27 = vadd.f32 %v192_v13, %v191_v63 }
  0xc8   :  { %v133_v11 = vadd.f32 %v115_v12, %v114_v8 }
  0xc9   :  { %v206_v26 = vadd.f32 %v205_v3, %v204_v55  ;;  %v194_v29 = vrot.slane %v193_v27, 1  ;;  %v945_v55 = vld [vmem:[%s1617_s8] ss:$0 sm:$0xff] }
  0xcb   :  { %v207_v28 = vrot.slane %v206_v26, 1  ;;  %v195_v33 = vadd.f32 %v194_v29, %v193_v27 }
  0xcd   :  { %v208_v30 = vadd.f32 %v207_v28, %v206_v26  ;;  %v215_v52 = vadd.f32 %v942_v31, %v195_v33 }
  0xcf   :  { %v216_v34 = vadd.f32 %v942_v31, %v208_v30  ;;  %v217_v36 = vmax.f32 %v215_v52, 0.0  ;;  %v371_v31 = vstv %s941_s7 }
  0xd1   :  { %v218_v60 = vmax.f32 %v216_v34, 0.0  ;;  %v222_v38 = vrot.slane %v217_v36, %v1285_v58 }
  0xd3   :  { %v229_v37 = vrot.slane %v218_v60, %v1285_v58 }
  0xe4   :  { %128 = vadd.xlane.f32.xlu0 %v127_v56 }
  0xe8   :  { %131 = vadd.xlane.f32.xlu0 %v130_v4 }
  0xea   :  { %134 = vadd.xlane.f32.xlu1 %v133_v11 }
  0xfb   :  { %231 = vbcast.lane.b32.xlu1 %v229_v37, 256 }
  0xfe   :  { %224 = vbcast.lane.b32.xlu0 %v222_v38, 256 }
 0x137   :  { %v327_v39 = vpop.permute.xlu0 %326 }
 0x138   :  { %v329_v40 = vmul.f32 %v327_v39, %v168_v57  ;;  %v320_v41 = vpop.permute.xlu1 %319 }
 0x139   :  { %v328_v44 = vmul.f32 %v320_v41, %v168_v57 }
 0x13a   :  { %v337_v32 = vsel %vm235_vm4, %v329_v40, 0.0 }
 0x13b   :  { %v338_v43 = vrot.slane %v337_v32, 4  ;;  %v330_v14 = vsel %vm235_vm4, %v328_v44, 0.0 }
 0x13c   :  { %v331_v45 = vrot.slane %v330_v14, 4 }
 0x13d   :  { %v339_v50 = vadd.f32 %v338_v43, %v337_v32 }
 0x13e   :  { %v332_v51 = vadd.f32 %v331_v45, %v330_v14  ;;  %v148_v45 = vmul.f32 0.00390625, %v1270_v21 }
 0x13f   :  { %v340_v47 = vrot.slane %v339_v50, 2 }
 0x140   :  { %v333_v35 = vrot.slane %v332_v51, 2 }
 0x141   :  { %v341_v53 = vadd.f32 %v340_v47, %v339_v50 }
 0x142   :  { %v334_v56 = vadd.f32 %v333_v35, %v332_v51  ;;  %v466_v35 = vrot.slane %v148_v45, %v1131_v17 }
 0x143   :  { %v342_v49 = vrot.slane %v341_v53, 1 }
 0x144   :  { %v335_v62 = vrot.slane %v334_v56, 1 }
 0x145   :  { %v343_v59 = vadd.f32 %v342_v49, %v341_v53 }
 0x146   :  { %v336_v3 = vadd.f32 %v335_v62, %v334_v56  ;;  %v161_v62 = vld [vmem:[%s1612_s3] sm:$0x3] }
 0x147   :  { %v351_v63 = vadd.f32 %v945_v55, %v343_v59 }
 0x148   :  { %v350_v8 = vadd.f32 %v945_v55, %v336_v3 }
 0x149   :  { %v353_v4 = vsub.f32 0.0, %v351_v63 }
 0x14a   :  { %v352_v13 = vsub.f32 0.0, %v350_v8 }
 0x14b   :  { %v356_v12 = vmul.f32 1.442695, %v353_v4 }
 0x14c   :  { %v354_v26 = vmul.f32 1.442695, %v352_v13 }
 0x14d   :  { %950 = vpow2.f32 %v356_v12 }
 0x14e   :  { %952 = vpow2.f32 %v354_v26 }
 0x157   :  { %v951_v11 = vpop.eup %950 }
 0x158   :  { %v359_v27 = vadd.f32 1.0, %v951_v11  ;;  %v953_v28 = vpop.eup %952 }
 0x159   :  { %v358_v29 = vadd.f32 1.0, %v953_v28 }
 0x15a   :  { %954 = vrcp.f32 %v359_v27 }
 0x15b   :  { %956 = vrcp.f32 %v358_v29 }
 0x164   :  { %v955_v30 = vpop.eup %954 }
 0x165   :  { %v370_v33 = vadd.f32 1.0, %v955_v30  ;;  %v957_v34 = vpop.eup %956 }
 0x166   :  { %v369_v60 = vadd.f32 1.0, %v957_v34 }
 0x167   :  { %v1342_v52 = vmul.f32 %v371_v31, %v370_v33 }
 0x168   :  { %v1349_v57 = vmul.f32 %v371_v31, %v369_v60 }
 0x169   :  { %v431_v36 = vmul.f32 %v1261_v61, %v1342_v52  ;;  %v448_v37 = vmul.f32 2.0, %v1342_v52  ;;  %v454_v38 = vmul.f32 %v1342_v52, %v1342_v52 }
 0x16a   :  { %v430_v32 = vmul.f32 %v1268_v20, %v1349_v57  ;;  %v453_v11 = vmul.f32 %v1349_v57, %v1349_v57 }
 0x16b   :  { %v434_v39 = vrot.slane %v431_v36, 7  ;;  %v450_v40 = vmul.f32 %v448_v37, %v1261_v61  ;;  %v504_v43 = vmul.f32 %v1282_v54, %v454_v38  ;;  %v447_v54 = vmul.f32 2.0, %v1349_v57 }
 0x16d   :  { %v452_v41 = vsub.f32 1.0, %v450_v40  ;;  %v436_v44 = vsel %vm435_vm5, %v434_v39, %v430_v32  ;;  %v449_v12 = vmul.f32 %v447_v54, %v1268_v20 }
 0x16e   :  { %v438_v50 = vsel %vm235_vm4, %v436_v44, 0.0 }
 0x16f   :  { %v506_v14 = vadd.f32 %v504_v43, %v452_v41  ;;  %v439_v51 = vrot.slane %v438_v50, 4  ;;  %v451_v31 = vsub.f32 1.0, %v449_v12 }
 0x171   :  { %v129_v47 = vpop.xlane.xlu0 %128  ;;  %v440_v55 = vadd.f32 %v439_v51, %v438_v50  ;;  %v509_v60 = vrot.slane %v506_v14, 7  ;;  %v943_v14 = vld [vmem:[%s1613_s4] ss:$0 sm:$0xff]  ;;  %s172_s4 = sld [smem:[#allocation2]] }
 0x172   :  { %v149_v53 = vmul.f32 0.00390625, %v129_v47 }
 0x173   :  { %v441_v4 = vrot.slane %v440_v55, 2 }
 0x174   :  { %v470_v61 = vrot.slane %v149_v53, %v1192_v42 }
 0x175   :  { %v132_v49 = vpop.xlane.xlu0 %131  ;;  %v442_v29 = vadd.f32 %v441_v4, %v440_v55 }
 0x176   :  { %v471_v56 = vsel %vm393_vm0, %v470_v61, %v466_v35  ;;  %v150_v59 = vmul.f32 0.00390625, %v132_v49 }
 0x177   :  { %v135_v63 = vpop.xlane.xlu1 %134  ;;  %v443_v38 = vrot.slane %v442_v29, 1 }
 0x178   :  { %v475_v21 = vrot.slane %v150_v59, %v1195_v46  ;;  %v151_v8 = vmul.f32 0.00390625, %v135_v63 }
 0x179   :  { %v225_v3 = vpop.permute.xlu0 %224  ;;  %v444_v45 = vadd.f32 %v443_v38, %v442_v29 }
 0x17a   :  { %v476_v17 = vsel %vm400_vm2, %v475_v21, %v471_v56  ;;  %v233_v42 = vmul.f32 %v225_v3, %v161_v62  ;;  %v480_v13 = vrot.slane %v151_v8, %v1198_v48 }
 0x17b   :  { %v232_v28 = vpop.permute.xlu1 %231  ;;  %v445_v55 = vmul.f32 0.5, %v444_v45 }
 0x17c   :  { %v236_v26 = vsel %vm235_vm4, %v233_v42, 0.0  ;;  %v481_v46 = vsel %vm407_vm3, %v480_v13, %v476_v17  ;;  %v234_v30 = vmul.f32 %v232_v28, %v161_v62 }
 0x17d   :  { %v237_v27 = vrot.slane %v236_v26, 4  ;;  %v503_v33 = vmul.f32 %v481_v46, %v453_v11  ;;  %v446_v3 = vsub.f32 1.0, %v445_v55 }
 0x17e   :  { %v243_v36 = vsel %vm235_vm4, %v234_v30, 0.0  ;;  %v170_v30 = vld [vmem:[%s1618_s9] sm:$0x1] }
 0x17f   :  { %v238_v34 = vadd.f32 %v237_v27, %v236_v26  ;;  %v505_v20 = vadd.f32 %v503_v33, %v451_v31  ;;  %v244_v48 = vrot.slane %v243_v36, 4  ;;  %v520_v12 = vmul.f32 %v446_v3, %v446_v3 }
 0x181   :  { %v239_v37 = vrot.slane %v238_v34, 2  ;;  %v510_v39 = vsel %vm435_vm5, %v509_v60, %v505_v20  ;;  %v245_v32 = vadd.f32 %v244_v48, %v243_v36  ;;  %v366_v36 = vstv %s172_s4 }
 0x182   :  { %v512_v41 = vsel %vm235_vm4, %v510_v39, 0.0 }
 0x183   :  { %v240_v40 = vadd.f32 %v239_v37, %v238_v34  ;;  %v513_v43 = vrot.slane %v512_v41, 4  ;;  %v246_v50 = vrot.slane %v245_v32, 2  ;;  %v526_v34 = vsub.f32 1.0, %v446_v3 }
 0x185   :  { %v241_v44 = vrot.slane %v240_v40, 1  ;;  %v514_v47 = vadd.f32 %v513_v43, %v512_v41  ;;  %v247_v53 = vadd.f32 %v246_v50, %v245_v32  ;;  %v171_v41 = vld [vmem:[%s1619_s10] sm:$0x1] }
 0x187   :  { %v242_v51 = vadd.f32 %v241_v44, %v240_v40  ;;  %v515_v35 = vrot.slane %v514_v47, 2  ;;  %v248_v49 = vrot.slane %v247_v53, 1 }
 0x189   :  { %v256_v61 = vadd.f32 %v943_v14, %v242_v51  ;;  %v516_v56 = vadd.f32 %v515_v35, %v514_v47  ;;  %v249_v54 = vadd.f32 %v248_v49, %v247_v53 }
 0x18b   :  { %v258_v59 = vsub.f32 0.0, %v256_v61  ;;  %v517_v62 = vrot.slane %v516_v56, 1  ;;  %v257_v63 = vadd.f32 %v943_v14, %v249_v54 }
 0x18d   :  { %v260_v21 = vmul.f32 1.442695, %v258_v59  ;;  %v518_v4 = vadd.f32 %v517_v62, %v516_v56  ;;  %v259_v17 = vsub.f32 0.0, %v257_v63 }
 0x18f   :  { %958 = vpow2.f32 %v260_v21  ;;  %v519_v8 = vmul.f32 0.5, %v518_v4  ;;  %v262_v42 = vmul.f32 1.442695, %v259_v17 }
 0x191   :  { %960 = vpow2.f32 %v262_v42  ;;  %v521_v13 = vsub.f32 %v519_v8, %v520_v12 }
 0x193   :  { %v522_v26 = vmax.f32 %v521_v13, 0.0 }
 0x195   :  { %v523_v11 = vadd.f32 1e-05, %v522_v26 }
 0x197   :  { %962 = vrsqrt.f32 %v523_v11 }
 0x199   :  { %v959_v27 = vpop.eup %958 }
 0x19a   :  { %v264_v28 = vadd.f32 1.0, %v959_v27 }
 0x19b   :  { %v961_v29 = vpop.eup %960 }
 0x19c   :  { %964 = vrcp.f32 %v264_v28  ;;  %v265_v46 = vadd.f32 1.0, %v961_v29 }
 0x19e   :  { %966 = vrcp.f32 %v265_v46 }
 0x1a1   :  { %v963_v31 = vpop.eup %962 }
 0x1a2   :  { %v525_v33 = vmul.f32 %v963_v31, %v170_v30 }
 0x1a4   :  { %v527_v20 = vmul.f32 %v526_v34, %v525_v33  ;;  %v532_v50 = vrot.slane %v525_v33, %v1285_v58 }
 0x1a6   :  { %v965_v60 = vpop.eup %964  ;;  %v528_v44 = vadd.f32 %v527_v20, %v171_v41  ;;  %v533_v14 = vmul.f32 %v532_v50, %v1349_v57  ;;  %v534_v51 = vmul.f32 %v532_v50, %v1342_v52 }
 0x1a7   :  { %v364_v37 = vadd.f32 1.0, %v965_v60 }
 0x1a8   :  { %v967_v38 = vpop.eup %966  ;;  %v594_v45 = vrot.slane %v528_v44, %v1285_v58  ;;  %v535_v47 = vsub.f32 0.0, %v533_v14  ;;  %v536_v35 = vsub.f32 0.0, %v534_v51 }
 0x1a9   :  { %v367_v48 = vmul.f32 %v366_v36, %v364_v37  ;;  %v365_v40 = vadd.f32 1.0, %v967_v38 }
 0x1aa   :  { %v613_v53 = vrot.slane %v535_v47, %v1285_v58  ;;  %v632_v61 = vrot.slane %v536_v35, %v1285_v58 }
 0x1ab   :  { %v540_v39 = vrot.slane %v367_v48, %v1285_v58  ;;  %v368_v32 = vmul.f32 %v366_v36, %v365_v40 }
 0x1ad   :  { %546 = vbcast.lane.b32.xlu1 %v540_v39, 264  ;;  %542 = vbcast.lane.b32.xlu0 %v540_v39, 256  ;;  %v559_v43 = vrot.slane %v368_v32, %v1285_v58 }
 0x1b1   :  { %554 = vbcast.lane.b32.xlu1 %v540_v39, 280  ;;  %550 = vbcast.lane.b32.xlu0 %v540_v39, 272 }
 0x1b5   :  { %565 = vbcast.lane.b32.xlu1 %v559_v43, 264  ;;  %561 = vbcast.lane.b32.xlu0 %v559_v43, 256 }
 0x1b9   :  { %600 = vbcast.lane.b32.xlu1 %v594_v45, 264  ;;  %596 = vbcast.lane.b32.xlu0 %v594_v45, 256 }
 0x1bd   :  { %608 = vbcast.lane.b32.xlu1 %v594_v45, 280  ;;  %604 = vbcast.lane.b32.xlu0 %v594_v45, 272 }
 0x1c1   :  { %615 = vbcast.lane.b32.xlu1 %v613_v53, 256  ;;  %623 = vbcast.lane.b32.xlu0 %v613_v53, 272 }
 0x1c5   :  { %619 = vbcast.lane.b32.xlu1 %v613_v53, 264  ;;  %634 = vbcast.lane.b32.xlu0 %v632_v61, 256 }
 0x1c9   :  { %627 = vbcast.lane.b32.xlu1 %v613_v53, 280  ;;  %642 = vbcast.lane.b32.xlu0 %v632_v61, 272 }
 0x1cd   :  { %638 = vbcast.lane.b32.xlu1 %v632_v61, 264  ;;  %569 = vbcast.lane.b32.xlu0 %v559_v43, 272 }
 0x1d1   :  { %646 = vbcast.lane.b32.xlu1 %v632_v61, 280 }
 0x1d5   :  { %573 = vbcast.lane.b32.xlu1 %v559_v43, 280 }
 0x21f   :  { %v543_v57 = vpop.permute.xlu0 %542  ;;  %v547_v49 = vpop.permute.xlu1 %546 }
 0x220   :  { %v575_v27 = vmul.f32 %v543_v57, %v1083_v2  ;;  %v576_v28 = vmul.f32 %v543_v57, %v1090_v5  ;;  %v577_v29 = vmul.f32 %v547_v49, %v1107_v9  ;;  %v578_v46 = vmul.f32 %v547_v49, %v1112_v10 }
 0x223   :  { %v551_v52 = vpop.permute.xlu0 %550  ;;  %v555_v55 = vpop.permute.xlu1 %554 }
 0x224   :  { %v579_v33 = vmul.f32 %v551_v52, %v1136_v18  ;;  %v580_v34 = vmul.f32 %v551_v52, %v1141_v19  ;;  %v581_v20 = vmul.f32 %v555_v55, %v1160_v24 }
 0x227   :  { %v562_v56 = vpop.permute.xlu0 %561  ;;  %v1393_v59 = vpop.permute.xlu1 %565 }
 0x22b   :  { %v597_v54 = vpop.permute.xlu0 %596  ;;  %v1395_v62 = vpop.permute.xlu1 %600 }
 0x22f   :  { %v605_v21 = vpop.permute.xlu0 %604  ;;  %v1397_v58 = vpop.permute.xlu1 %608 }
 0x233   :  { %v624_v63 = vpop.permute.xlu0 %623  ;;  %v616_v3 = vpop.permute.xlu1 %615 }
 0x234   :  { %v652_v4 = vmul.f32 %v624_v63, %v1136_v18  ;;  %v653_v17 = vmul.f32 %v624_v63, %v1141_v19  ;;  %v648_v8 = vmul.f32 %v616_v3, %v1083_v2  ;;  %v649_v42 = vmul.f32 %v616_v3, %v1090_v5 }
 0x235   :  { %v582_v5 = vmul.f32 %v555_v55, %v1165_v25  ;;  %v584_v63 = vmul.f32 %v562_v56, %v1078_v1 }
 0x236   :  { %v668_v12 = vadd.f32 %v652_v4, %v605_v21  ;;  %v669_v13 = vadd.f32 %v653_v17, %v605_v21  ;;  %v664_v26 = vadd.f32 %v648_v8, %v597_v54  ;;  %v665_v11 = vadd.f32 %v649_v42, %v597_v54 }
 0x237   :  { %v635_v30 = vpop.permute.xlu0 %634  ;;  %v620_v31 = vpop.permute.xlu1 %619  ;;  %v585_v8 = vmul.f32 %v1393_v59, %v1095_v6 }
 0x238   :  { %v680_v60 = vmax.f32 %v664_v26, 0.0  ;;  %v681_v36 = vmax.f32 %v665_v11, 0.0  ;;  %v684_v37 = vmax.f32 %v668_v12, 0.0  ;;  %v650_v48 = vmul.f32 %v620_v31, %v1107_v9 }
 0x239   :  { %v651_v2 = vmul.f32 %v620_v31, %v1112_v10  ;;  %v685_v38 = vmax.f32 %v669_v13, 0.0  ;;  %v656_v39 = vmul.f32 %v635_v30, %v1073_v0  ;;  %v657_v40 = vmul.f32 %v635_v30, %v1078_v1 }
 0x23a   :  { %v666_v18 = vadd.f32 %v650_v48, %v1395_v62  ;;  %v1417_v43 = vadd.f32 %v680_v60, %v575_v27  ;;  %v1419_v44 = vadd.f32 %v681_v36, %v576_v28  ;;  %v583_v9 = vmul.f32 %v562_v56, %v1073_v0 }
 0x23b   :  { %v667_v19 = vadd.f32 %v651_v2, %v1395_v62  ;;  %v643_v32 = vpop.permute.xlu0 %642  ;;  %v628_v41 = vpop.permute.xlu1 %627  ;;  %v1426_v53 = vadd.f32 %v684_v37, %v579_v33  ;;  %v672_v35 = vadd.f32 %v656_v39, %v597_v54  ;;  %v1430_v49 = vadd.f32 %v685_v38, %v580_v34 }
 0x23c   :  { %v660_v10 = vmul.f32 %v643_v32, %v1123_v15  ;;  %v654_v50 = vmul.f32 %v628_v41, %v1160_v24  ;;  %v655_v45 = vmul.f32 %v628_v41, %v1165_v25  ;;  %v682_v14 = vmax.f32 %v666_v18, 0.0 }
 0x23d   :  { %v683_v47 = vmax.f32 %v667_v19, 0.0  ;;  %v661_v51 = vmul.f32 %v643_v32, %v1128_v16  ;;  %v673_v0 = vadd.f32 %v657_v40, %v597_v54  ;;  %v712_v52 = vadd.f32 %v1419_v44, %v1417_v43 }
 0x23e   :  { %v670_v61 = vadd.f32 %v654_v50, %v1397_v58  ;;  %v671_v57 = vadd.f32 %v655_v45, %v1397_v58  ;;  %v1434_v55 = vadd.f32 %v682_v14, %v577_v29  ;;  %v676_v3 = vadd.f32 %v660_v10, %v605_v21 }
 0x23f   :  { %v639_v24 = vpop.permute.xlu1 %638  ;;  %v1436_v25 = vadd.f32 %v683_v47, %v578_v46  ;;  %v677_v42 = vadd.f32 %v661_v51, %v605_v21  ;;  %713 = vadd.xlane.f32.xlu0 %v712_v52  ;;  %v688_v13 = vmax.f32 %v672_v35, 0.0  ;;  %v689_v1 = vmax.f32 %v673_v0, 0.0  ;;  %v570_v56 = vpop.permute.xlu0 %569 }
 0x240   :  { %v686_v4 = vmax.f32 %v670_v61, 0.0  ;;  %v687_v17 = vmax.f32 %v671_v57, 0.0  ;;  %v658_v54 = vmul.f32 %v639_v24, %v1095_v6  ;;  %v659_v12 = vmul.f32 %v639_v24, %v1100_v7 }
 0x241   :  { %v715_v26 = vadd.f32 %v1436_v25, %v1434_v55  ;;  %v718_v21 = vadd.f32 %v1430_v49, %v1426_v53  ;;  %v586_v46 = vmul.f32 %v1393_v59, %v1100_v7  ;;  %v692_v30 = vmax.f32 %v676_v3, 0.0 }
 0x242   :  { %v1445_v11 = vadd.f32 %v686_v4, %v581_v20  ;;  %v1447_v27 = vadd.f32 %v687_v17, %v582_v5  ;;  %v674_v28 = vadd.f32 %v658_v54, %v1395_v62  ;;  %v675_v29 = vadd.f32 %v659_v12, %v1395_v62 }
 0x243   :  { %v647_v6 = vpop.permute.xlu1 %646  ;;  %716 = vadd.xlane.f32.xlu1 %v715_v26  ;;  %v693_v34 = vmax.f32 %v677_v42, 0.0  ;;  %719 = vadd.xlane.f32.xlu0 %v718_v21  ;;  %v587_v20 = vmul.f32 %v570_v56, %v1123_v15  ;;  %v588_v37 = vmul.f32 %v570_v56, %v1128_v16  ;;  %v1463_v2 = vadd.f32 %v688_v13, %v583_v9 }
 0x244   :  { %v662_v31 = vmul.f32 %v647_v6, %v1150_v22  ;;  %v663_v33 = vmul.f32 %v647_v6, %v1155_v23  ;;  %v690_v60 = vmax.f32 %v674_v28, 0.0  ;;  %v691_v36 = vmax.f32 %v675_v29, 0.0 }
 0x245   :  { %v721_v62 = vadd.f32 %v1447_v27, %v1445_v11  ;;  %v1465_v5 = vadd.f32 %v689_v1, %v584_v63  ;;  %v1479_v41 = vadd.f32 %v692_v30, %v587_v20  ;;  %v1481_v9 = vadd.f32 %v693_v34, %v588_v37 }
 0x246   :  { %v678_v48 = vadd.f32 %v662_v31, %v1397_v58  ;;  %v679_v7 = vadd.f32 %v663_v33, %v1397_v58  ;;  %v1467_v38 = vadd.f32 %v690_v60, %v585_v8  ;;  %v1469_v39 = vadd.f32 %v691_v36, %v586_v46 }
 0x247   :  { %v574_v59 = vpop.permute.xlu1 %573  ;;  %722 = vadd.xlane.f32.xlu0 %v721_v62  ;;  %v724_v10 = vadd.f32 %v1465_v5, %v1463_v2  ;;  %v743_v50 = vmul.f32 %v1436_v25, %v1436_v25  ;;  %v730_v45 = vadd.f32 %v1481_v9, %v1479_v41  ;;  %v740_v14 = vmul.f32 %v1417_v43, %v1417_v43 }
 0x248   :  { %v694_v40 = vmax.f32 %v678_v48, 0.0  ;;  %v695_v18 = vmax.f32 %v679_v7, 0.0  ;;  %v589_v19 = vmul.f32 %v574_v59, %v1150_v22  ;;  %v590_v15 = vmul.f32 %v574_v59, %v1155_v23 }
 0x249   :  { %v727_v16 = vadd.f32 %v1469_v39, %v1467_v38  ;;  %v742_v23 = vmul.f32 %v1434_v55, %v1434_v55  ;;  %v741_v47 = vmul.f32 %v1419_v44, %v1419_v44  ;;  %v746_v35 = vmul.f32 %v1445_v11, %v1445_v11 }
 0x24a   :  { %v1475_v58 = vadd.f32 %v694_v40, %v589_v19  ;;  %v1477_v32 = vadd.f32 %v695_v18, %v590_v15  ;;  %v747_v61 = vmul.f32 %v1447_v27, %v1447_v27  ;;  %v744_v0 = vmul.f32 %v1426_v53, %v1426_v53 }
 0x24b   :  { %728 = vadd.xlane.f32.xlu1 %v727_v16  ;;  %725 = vadd.xlane.f32.xlu0 %v724_v10  ;;  %v759_v51 = vadd.f32 %v743_v50, %v742_v23  ;;  %v756_v57 = vadd.f32 %v741_v47, %v740_v14  ;;  %v745_v52 = vmul.f32 %v1430_v49, %v1430_v49  ;;  %v991_v29 = vmov 0  }
 0x24c   :  { %v733_v22 = vadd.f32 %v1477_v32, %v1475_v58  ;;  %v765_v24 = vadd.f32 %v747_v61, %v746_v35  ;;  %v750_v63 = vmul.f32 %v1467_v38, %v1467_v38  ;;  %v751_v3 = vmul.f32 %v1469_v39, %v1469_v39  ;;  %949 = vset.pattern.permute.xlu1 %v991_v29 }
 0x24d   :  { %v762_v4 = vadd.f32 %v745_v52, %v744_v0  ;;  %v748_v17 = vmul.f32 %v1463_v2, %v1463_v2  ;;  %v749_v8 = vmul.f32 %v1465_v5, %v1465_v5  ;;  %v754_v54 = vmul.f32 %v1475_v58, %v1475_v58  ;;  %948 = vset.pattern.permute.xlu0 %v991_v29 }
 0x24e   :  { %v771_v42 = vadd.f32 %v751_v3, %v750_v63  ;;  %v755_v12 = vmul.f32 %v1477_v32, %v1477_v32  ;;  %v752_v26 = vmul.f32 %v1479_v41, %v1479_v41  ;;  %v753_v1 = vmul.f32 %v1481_v9, %v1481_v9 }
 0x24f   :  { %734 = vadd.xlane.f32.xlu1 %v733_v22  ;;  %731 = vadd.xlane.f32.xlu0 %v730_v45  ;;  %v768_v13 = vadd.f32 %v749_v8, %v748_v17 }
 0x250   :  { %v777_v56 = vadd.f32 %v755_v12, %v754_v54  ;;  %v774_v28 = vadd.f32 %v753_v1, %v752_v26 }
 0x253   :  { %760 = vadd.xlane.f32.xlu1 %v759_v51  ;;  %757 = vadd.xlane.f32.xlu0 %v756_v57 }
 0x257   :  { %766 = vadd.xlane.f32.xlu1 %v765_v24  ;;  %763 = vadd.xlane.f32.xlu0 %v762_v4 }
 0x25b   :  { %772 = vadd.xlane.f32.xlu1 %v771_v42  ;;  %769 = vadd.xlane.f32.xlu0 %v768_v13 }
 0x25f   :  { %778 = vadd.xlane.f32.xlu1 %v777_v56  ;;  %775 = vadd.xlane.f32.xlu0 %v774_v28 }
 0x2cc   :  { %v714_v21 = vpop.xlane.xlu0 %713 }
 0x2d0   :  { %v720_v6 = vpop.xlane.xlu0 %719  ;;  %v717_v46 = vpop.xlane.xlu1 %716 }
 0x2d4   :  { %v723_v30 = vpop.xlane.xlu0 %722 }
 0x2d8   :  { %v729_v31 = vpop.xlane.xlu1 %728  ;;  %v726_v33 = vpop.xlane.xlu0 %725 }
 0x2d9   :  { %v737_v20 = vadd.f32 %v729_v31, %v717_v46  ;;  %v736_v48 = vadd.f32 %v726_v33, %v714_v21  ;;  %v813_v21 = vld [vmem:[%s1620_s11 + $0x8] sm:$0xff]  ;;  %v812_v46 = vld [vmem:[%s1620_s11] sm:$0xff] }
 0x2db   :  { %v785_v40 = vmul.f32 0.001953125, %v737_v20  ;;  %v784_v15 = vmul.f32 0.001953125, %v736_v48  ;;  %v815_v20 = vld [vmem:[%s1620_s11 + $0x18] sm:$0xff] }
 0x2dc   :  { %v735_v34 = vpop.xlane.xlu1 %734  ;;  %v732_v60 = vpop.xlane.xlu0 %731 }
 0x2dd   :  { %v739_v7 = vadd.f32 %v735_v34, %v723_v30  ;;  %v738_v18 = vadd.f32 %v732_v60, %v720_v6  ;;  %v793_v23 = vmul.f32 %v785_v40, %v785_v40  ;;  %v792_v51 = vmul.f32 %v784_v15, %v784_v15  ;;  %v814_v34 = vld [vmem:[%s1620_s11 + $0x10] sm:$0xff] }
 0x2df   :  { %v787_v10 = vmul.f32 0.001953125, %v739_v7  ;;  %v786_v14 = vmul.f32 0.001953125, %v738_v18  ;;  %v820_v7 = vld [vmem:[%s1621_s12] sm:$0xff] }
 0x2e0   :  { %v761_v36 = vpop.xlane.xlu1 %760  ;;  %v758_v62 = vpop.xlane.xlu0 %757 }
 0x2e1   :  { %v795_v0 = vmul.f32 %v787_v10, %v787_v10  ;;  %v794_v17 = vmul.f32 %v786_v14, %v786_v14 }
 0x2e4   :  { %v767_v37 = vpop.xlane.xlu1 %766  ;;  %v764_v59 = vpop.xlane.xlu0 %763 }
 0x2e8   :  { %v773_v19 = vpop.xlane.xlu1 %772  ;;  %v770_v22 = vpop.xlane.xlu0 %769 }
 0x2e9   :  { %v781_v16 = vadd.f32 %v773_v19, %v761_v36  ;;  %v780_v50 = vadd.f32 %v770_v22, %v758_v62  ;;  %v821_v19 = vld [vmem:[%s1621_s12 + $0x8] sm:$0xff] }
 0x2eb   :  { %v789_v45 = vmul.f32 0.001953125, %v781_v16  ;;  %v788_v35 = vmul.f32 0.001953125, %v780_v50 }
 0x2ec   :  { %v779_v47 = vpop.xlane.xlu1 %778  ;;  %v776_v52 = vpop.xlane.xlu0 %775 }
 0x2ed   :  { %v797_v61 = vsub.f32 %v789_v45, %v793_v23  ;;  %v783_v57 = vadd.f32 %v779_v47, %v767_v37  ;;  %v796_v24 = vsub.f32 %v788_v35, %v792_v51  ;;  %v782_v3 = vadd.f32 %v776_v52, %v764_v59  ;;  %v822_v23 = vld [vmem:[%s1621_s12 + $0x10] sm:$0xff]  ;;  %v823_v45 = vld [vmem:[%s1621_s12 + $0x18] sm:$0xff] }
 0x2ef   :  { %v801_v63 = vmax.f32 %v797_v61, 0.0  ;;  %v791_v4 = vmul.f32 0.001953125, %v783_v57  ;;  %v800_v8 = vmax.f32 %v796_v24, 0.0  ;;  %v790_v54 = vmul.f32 0.001953125, %v782_v3 }
 0x2f1   :  { %v805_v42 = vadd.f32 1e-05, %v801_v63  ;;  %v799_v12 = vsub.f32 %v791_v4, %v795_v0  ;;  %v804_v13 = vadd.f32 1e-05, %v800_v8  ;;  %v798_v26 = vsub.f32 %v790_v54, %v794_v17 }
 0x2f3   :  { %968 = vrsqrt.f32 %v805_v42  ;;  %v803_v1 = vmax.f32 %v799_v12, 0.0  ;;  %v802_v56 = vmax.f32 %v798_v26, 0.0 }
 0x2f4   :  { %970 = vrsqrt.f32 %v804_v13 }
 0x2f5   :  { %v806_v28 = vadd.f32 1e-05, %v802_v56  ;;  %v807_v29 = vadd.f32 1e-05, %v803_v1 }
 0x2f7   :  { %972 = vrsqrt.f32 %v806_v28 }
 0x2f8   :  { %974 = vrsqrt.f32 %v807_v29 }
 0x2fd   :  { %v969_v6 = vpop.eup %968 }
 0x2fe   :  { %v817_v30 = vmul.f32 %v969_v6, %v813_v21  ;;  %v971_v31 = vpop.eup %970 }
 0x2ff   :  { %v816_v33 = vmul.f32 %v971_v31, %v812_v46 }
 0x300   :  { %839 = vperm.xlu1 %949, %v817_v30   ;;  %v825_v18 = vmul.f32 %v817_v30, %v785_v40 }
 0x301   :  { %834 = vperm.xlu0 %948, %v816_v33   ;;  %v973_v60 = vpop.eup %972  ;;  %v824_v48 = vmul.f32 %v816_v33, %v784_v15 }
 0x302   :  { %v818_v36 = vmul.f32 %v973_v60, %v814_v34  ;;  %v975_v62 = vpop.eup %974  ;;  %v829_v16 = vsub.f32 %v821_v19, %v825_v18 }
 0x303   :  { %v819_v37 = vmul.f32 %v975_v62, %v815_v20  ;;  %v828_v59 = vsub.f32 %v820_v7, %v824_v48 }
 0x304   :  { %844 = vperm.xlu1 %949, %v818_v36   ;;  %v826_v22 = vmul.f32 %v818_v36, %v786_v14 }
 0x305   :  { %v827_v50 = vmul.f32 %v819_v37, %v787_v10 }
 0x306   :  { %v830_v15 = vsub.f32 %v822_v23, %v826_v22 }
 0x307   :  { %v831_v40 = vsub.f32 %v823_v45, %v827_v50 }
 0x308   :  { %849 = vperm.xlu1 %949, %v819_v37  }
 0x30c   :  { %870 = vperm.xlu1 %949, %v828_v59  }
 0x310   :  { %875 = vperm.xlu1 %949, %v829_v16  }
 0x314   :  { %880 = vperm.xlu1 %949, %v830_v15  }
 0x318   :  { %885 = vperm.xlu1 %949, %v831_v40  }
 0x37f   :  { %v840_v47 = vpop.permute.xlu1 %839 }
 0x380   :  { %v835_v35 = vpop.permute.xlu0 %834  ;;  %v854_v17 = vmul.f32 %v840_v47, %v1434_v55  ;;  %v855_v8 = vmul.f32 %v840_v47, %v1436_v25  ;;  %v862_v42 = vmul.f32 %v840_v47, %v1467_v38  ;;  %v863_v54 = vmul.f32 %v840_v47, %v1469_v39 }
 0x381   :  { %v852_v14 = vmul.f32 %v835_v35, %v1417_v43  ;;  %v853_v57 = vmul.f32 %v835_v35, %v1419_v44  ;;  %v860_v0 = vmul.f32 %v835_v35, %v1463_v2  ;;  %v861_v52 = vmul.f32 %v835_v35, %v1465_v5 }
 0x383   :  { %v845_v51 = vpop.permute.xlu1 %844 }
 0x384   :  { %v856_v39 = vmul.f32 %v845_v51, %v1426_v53  ;;  %v857_v26 = vmul.f32 %v845_v51, %v1430_v49  ;;  %v864_v1 = vmul.f32 %v845_v51, %v1479_v41  ;;  %v865_v56 = vmul.f32 %v845_v51, %v1481_v9 }
 0x387   :  { %v850_v61 = vpop.permute.xlu1 %849 }
 0x388   :  { %v858_v30 = vmul.f32 %v850_v61, %v1445_v11  ;;  %v859_v31 = vmul.f32 %v850_v61, %v1447_v27  ;;  %v866_v33 = vmul.f32 %v850_v61, %v1475_v58  ;;  %v867_v34 = vmul.f32 %v850_v61, %v1477_v32 }
 0x38b   :  { %v871_v10 = vpop.permute.xlu1 %870 }
 0x38c   :  { %v888_v24 = vadd.f32 %v871_v10, %v852_v14  ;;  %v889_v63 = vadd.f32 %v871_v10, %v853_v57  ;;  %v896_v3 = vadd.f32 %v871_v10, %v860_v0  ;;  %v897_v4 = vadd.f32 %v871_v10, %v861_v52 }
 0x38e   :  { %v904_v43 = vmax.f32 %v888_v24, 0.0  ;;  %v905_v12 = vmax.f32 %v889_v63, 0.0  ;;  %v912_v44 = vmax.f32 %v896_v3, 0.0  ;;  %v913_v13 = vmax.f32 %v897_v4, 0.0 }
 0x38f   :  { %v876_v2 = vpop.permute.xlu1 %875 }
 0x390   :  { %920 = vst [vmem:[%s1623_s14] sm:$0xff] %v904_v43  ;;  %921 = vst [vmem:[%s1623_s14 + $0x8] sm:$0xff] %v905_v12  ;;  %v890_v55 = vadd.f32 %v876_v2, %v854_v17  ;;  %v891_v25 = vadd.f32 %v876_v2, %v855_v8  ;;  %v898_v5 = vadd.f32 %v876_v2, %v862_v42 }
 0x391   :  { %928 = vst [vmem:[%s1623_s14 + $0x40] sm:$0xff] %v912_v44  ;;  %929 = vst [vmem:[%s1623_s14 + $0x48] sm:$0xff] %v913_v13  ;;  %v899_v38 = vadd.f32 %v876_v2, %v863_v54 }
 0x392   :  { %v906_v28 = vmax.f32 %v890_v55, 0.0  ;;  %v907_v29 = vmax.f32 %v891_v25, 0.0  ;;  %v914_v21 = vmax.f32 %v898_v5, 0.0 }
 0x393   :  { %v915_v6 = vmax.f32 %v899_v38, 0.0  ;;  %v881_v46 = vpop.permute.xlu1 %880 }
 0x394   :  { %922 = vst [vmem:[%s1623_s14 + $0x10] sm:$0xff] %v906_v28  ;;  %923 = vst [vmem:[%s1623_s14 + $0x18] sm:$0xff] %v907_v29  ;;  %v892_v53 = vadd.f32 %v881_v46, %v856_v39  ;;  %v893_v49 = vadd.f32 %v881_v46, %v857_v26  ;;  %v900_v41 = vadd.f32 %v881_v46, %v864_v1 }
 0x395   :  { %930 = vst [vmem:[%s1623_s14 + $0x50] sm:$0xff] %v914_v21  ;;  %931 = vst [vmem:[%s1623_s14 + $0x58] sm:$0xff] %v915_v6  ;;  %v901_v9 = vadd.f32 %v881_v46, %v865_v56 }
 0x396   :  { %v908_v60 = vmax.f32 %v892_v53, 0.0  ;;  %v909_v36 = vmax.f32 %v893_v49, 0.0  ;;  %v916_v62 = vmax.f32 %v900_v41, 0.0 }
 0x397   :  { %v917_v20 = vmax.f32 %v901_v9, 0.0  ;;  %v886_v37 = vpop.permute.xlu1 %885 }
 0x398   :  { %924 = vst [vmem:[%s1623_s14 + $0x20] sm:$0xff] %v908_v60  ;;  %925 = vst [vmem:[%s1623_s14 + $0x28] sm:$0xff] %v909_v36  ;;  %v894_v11 = vadd.f32 %v886_v37, %v858_v30  ;;  %v895_v27 = vadd.f32 %v886_v37, %v859_v31  ;;  %v902_v58 = vadd.f32 %v886_v37, %v866_v33 }
 0x399   :  { %932 = vst [vmem:[%s1623_s14 + $0x60] sm:$0xff] %v916_v62  ;;  %933 = vst [vmem:[%s1623_s14 + $0x68] sm:$0xff] %v917_v20  ;;  %v903_v32 = vadd.f32 %v886_v37, %v867_v34 }
 0x39a   :  { %v910_v48 = vmax.f32 %v894_v11, 0.0  ;;  %v911_v7 = vmax.f32 %v895_v27, 0.0  ;;  %v918_v59 = vmax.f32 %v902_v58, 0.0 }
 0x39b   :  { %v919_v18 = vmax.f32 %v903_v32, 0.0 }
 0x39c   :  { %926 = vst [vmem:[%s1623_s14 + $0x30] sm:$0xff] %v910_v48  ;;  %927 = vst [vmem:[%s1623_s14 + $0x38] sm:$0xff] %v911_v7 }
 0x39d   :  { %934 = vst [vmem:[%s1623_s14 + $0x70] sm:$0xff] %v918_v59  ;;  %935 = vst [vmem:[%s1623_s14 + $0x78] sm:$0xff] %v919_v18 }
 0x39e   :  { %940 = vsyncpa [#allocation3], 1 }

</bundles_post_ra>
